<compile_context>
chip_gen: v7x
topology: tpu7x:2x2x1
jax: 0.10.0
libtpu: 0.0.40
codegen_flags: <defaults>
</compile_context>

<pallas_src>
import functools

import jax
import jax.numpy as jnp
from jax.experimental import pallas as pl
from jax.experimental.pallas import tpu as pltpu

FEAT_DIM = 2048        # resnet152 fc.in_features
BN_EPS = 1e-5


# ----------------------------- Pallas kernel -----------------------------

def _conv_classifier_kernel(x_ref, w1_ref, b1_ref, w2_ref, b2_ref,
                            w3_ref, b3_ref, o_ref, *, c, hw):
    """Whole forward in one body (grid=(1,), everything resident in VMEM).

    x_ref : (N, C*H*W)  flattened frames
    w1/b1 : stub projection to 2048-dim features (+ReLU); w1 is (C, 2048) with
            the GAP 1/(H*W) scale pre-folded in                [resnet stand-in]
    w2/b2 : Linear(2048, latent) with eval-mode BN pre-folded
    w3/b3 : Linear(latent, num_classes) zero/-inf padded to a lane-dense width
    o_ref : (N, num_classes_padded) softmax probabilities
    """
    n = x_ref.shape[0]
    f = w1_ref.shape[1]

    # In-kernel GAP + stub projection without materialising a 768x2048 weight:
    # feats[n, :] = sum_c ( sum_s x[n, c, s] ) * w1[c, :]
    # Per-channel lane reductions (XLU) + (N,1)x(1,F) broadcast FMAs (VPU).
    feats = jnp.zeros((n, f), jnp.float32)
    for ci in range(c):                                   # static unroll, C=3
        s_c = jnp.sum(x_ref[:, ci * hw:(ci + 1) * hw],
                      axis=-1, keepdims=True)             # (N, 1)
        feats = feats + s_c * w1_ref[ci:ci + 1, :]        # (N, F)
    feats = jnp.maximum(feats + b1_ref[...], 0.0)         # bias + ReLU

    # Linear(2048, latent) with BN(eval) folded in.
    z = jnp.dot(feats, w2_ref[...], preferred_element_type=jnp.float32)
    z = z + b2_ref[...]                                   # (N, latent)

    # Classifier + numerically-stable softmax (padded logits carry -1e30 bias
    # so they vanish under exp).
    logits = jnp.dot(z, w3_ref[...], preferred_element_type=jnp.float32)
    logits = logits + b3_ref[...]                         # (N, classes_padded)
    logits = logits - jnp.max(logits, axis=-1, keepdims=True)
    e = jnp.exp(logits)
    denom = jnp.sum(e, axis=-1, keepdims=True)
    o_ref[...] = (e * pl.reciprocal(denom, approx=False)).astype(o_ref.dtype)


def conv_classifier_fused(x_flat, w1, b1, w2, b2, w3, b3, *, c, hw):
    n, k1 = x_flat.shape
    f = w1.shape[1]
    l = w2.shape[1]
    ncp = w3.shape[1]          # lane-dense (multiple of 128) padded class count

    def full(shape):
        return pl.BlockSpec(shape, lambda i: (0,) * len(shape))

    kernel = functools.partial(_conv_classifier_kernel, c=c, hw=hw)

    return pl.pallas_call(
        kernel,
        out_shape=jax.ShapeDtypeStruct((n, ncp), jnp.float32),
        grid_spec=pltpu.PrefetchScalarGridSpec(
            num_scalar_prefetch=0,
            grid=(1,),
            in_specs=[
                full((n, k1)),                  # x            (~48 KiB)
                full((c, f)), full((1, f)),     # stub         (~32 KiB)
                full((f, l)), full((1, l)),     # Linear+BN    (~1 MiB)
                full((l, ncp)), full((1, ncp)),  # classifier  (~64 KiB)
            ],
            out_specs=full((n, ncp))),
        compiler_params=pltpu.CompilerParams(
            dimension_semantics=("arbitrary",),     # single-shot; keep one core
            vmem_limit_bytes=32 * 1024 * 1024),
    )(x_flat, w1, b1, w2, b2, w3, b3)


# ----------------------------- Model wrapper -----------------------------

def init_params(key, c, latent_dim, num_classes):
    ks = jax.random.split(key, 6)

    def w(k, shape, s=0.05):
        return (s * jax.random.normal(k, shape)).astype(jnp.float32)

    return {
        # backbone stub (stand-in for resnet152 trunk): GAP -> Linear(C, 2048) -> ReLU
        'w_stub': w(ks[0], (c, FEAT_DIM)), 'b_stub': w(ks[1], (FEAT_DIM,)),
        # final[0]: Linear(2048, latent_dim)   (final[1] = BatchNorm1d, eval stats)
        'w_enc': w(ks[2], (FEAT_DIM, latent_dim)), 'b_enc': w(ks[3], (latent_dim,)),
        # final[2]: Linear(latent_dim, num_classes)   (final[3] = Softmax)
        'w_cls': w(ks[4], (latent_dim, num_classes)), 'b_cls': w(ks[5], (num_classes,)),
    }


def fold_params(p, hw, num_classes):
    """Host-side pre-folding (done once, outside the jitted forward).

    * GAP 1/(H*W) scale folded into the (C, 2048) stub weight (NOT repeated).
    * eval-mode BatchNorm1d (mean=0, var=1, gamma=1, beta=0) folded into the
      encoder weight/bias as a 1/sqrt(1+eps) scale.
    * classifier weight/bias padded to a lane-dense width (multiple of 128);
      padded logits get a -1e30 bias so they vanish under softmax.
    """
    bnv = 1.0 / jnp.sqrt(jnp.float32(1.0 + BN_EPS))

    nc_pad = max(128, int(pl.cdiv(num_classes, 128)) * 128)
    latent = p['w_cls'].shape[0]
    w3_pad = jnp.zeros((latent, nc_pad), jnp.float32)
    w3_pad = w3_pad.at[:, :num_classes].set(p['w_cls'].astype(jnp.float32))
    b3_pad = jnp.full((1, nc_pad), -1e30, jnp.float32)
    b3_pad = b3_pad.at[0, :num_classes].set(p['b_cls'].astype(jnp.float32))

    return {
        'w1': (p['w_stub'] / jnp.float32(hw)).astype(jnp.float32),   # (C, 2048)
        'b1': p['b_stub'].reshape(1, -1).astype(jnp.float32),
        'w2': (p['w_enc'] * bnv).astype(jnp.float32),
        'b2': (p['b_enc'] * bnv).reshape(1, -1).astype(jnp.float32),
        'w3': w3_pad,
        'b3': b3_pad,
    }


def conv_classifier_forward(x, fp, num_classes):
    B, T, C, H, W = x.shape
    x_flat = x.reshape(B * T, C * H * W)             # free reshape, no XLA compute
    probs = conv_classifier_fused(x_flat, fp['w1'], fp['b1'], fp['w2'], fp['b2'],
                                  fp['w3'], fp['b3'], c=C, hw=H * W)
    return probs[:, :num_classes].reshape(B, T, num_classes)


# ----------------------------- Pure-JAX reference -----------------------------

def reference_forward(x, p):
    B, T, C, H, W = x.shape
    bnv = 1.0 / jnp.sqrt(jnp.float32(1.0 + BN_EPS))
    gap = jnp.mean(x.reshape(B * T, C, H * W), axis=-1)           # (N, C)
    feats = jax.nn.relu(gap @ p['w_stub'] + p['b_stub'])          # (N, 2048)
    z = (feats @ p['w_enc'] + p['b_enc']) * bnv                   # Linear + BN(eval)
    logits = z @ p['w_cls'] + p['b_cls']                          # Linear
    return jax.nn.softmax(logits, axis=-1).reshape(B, T, -1)      # Softmax


# ----------------------------- main -----------------------------

if __name__ == "__main__":
    B, T, C, H, W = 2, 8, 3, 16, 16
    num_classes = 10
    latent_dim = 128

    params = init_params(jax.random.PRNGKey(0), C, latent_dim, num_classes)
    x = jax.random.normal(jax.random.PRNGKey(1), (B, T, C, H, W), jnp.float32)

    folded = fold_params(params, H * W, num_classes)   # host-side prefold, outside jit
    fwd = jax.jit(lambda xx, fp: conv_classifier_forward(xx, fp, num_classes))
    out = jax.block_until_ready(fwd(x, folded))

    ref = reference_forward(x, params)
    assert out.shape == (B, T, num_classes), out.shape
    assert bool(jnp.all(jnp.isfinite(out)))
    assert bool(jnp.allclose(out, ref, atol=1e-4, rtol=1e-4)), \
        float(jnp.max(jnp.abs(out - ref)))
    print("KERNEL_OK")
</pallas_src>

<mosaic_0001>
module attributes {stable_mosaic.version = 11 : i64} {
  func.func @_conv_classifier_kernel(%arg0: i32, %arg1: memref<16x768xf32, #tpu.memory_space<vmem>>, %arg2: memref<3x2048xf32, #tpu.memory_space<vmem>>, %arg3: memref<1x2048xf32, #tpu.memory_space<vmem>>, %arg4: memref<2048x128xf32, #tpu.memory_space<vmem>>, %arg5: memref<1x128xf32, #tpu.memory_space<vmem>>, %arg6: memref<128x128xf32, #tpu.memory_space<vmem>>, %arg7: memref<1x128xf32, #tpu.memory_space<vmem>>, %arg8: memref<16x128xf32, #tpu.memory_space<vmem>>) attributes {dimension_semantics = [#tpu.dimension_semantics<arbitrary>], iteration_bounds = array<i64: 1>, scalar_prefetch = 0 : i64, scratch_operands = 0 : i64, tpu.core_type = #tpu.core_type<tc>, window_params = [{pipeline_mode = #tpu.pipeline_mode<synchronous>, transform_indices = @transform_0, window_bounds = array<i64: 16, 768>}, {pipeline_mode = #tpu.pipeline_mode<synchronous>, transform_indices = @transform_1, window_bounds = array<i64: 3, 2048>}, {pipeline_mode = #tpu.pipeline_mode<synchronous>, transform_indices = @transform_2, window_bounds = array<i64: 1, 2048>}, {pipeline_mode = #tpu.pipeline_mode<synchronous>, transform_indices = @transform_3, window_bounds = array<i64: 2048, 128>}, {pipeline_mode = #tpu.pipeline_mode<synchronous>, transform_indices = @transform_4, window_bounds = array<i64: 1, 128>}, {pipeline_mode = #tpu.pipeline_mode<synchronous>, transform_indices = @transform_5, window_bounds = array<i64: 128, 128>}, {pipeline_mode = #tpu.pipeline_mode<synchronous>, transform_indices = @transform_6, window_bounds = array<i64: 1, 128>}, {pipeline_mode = #tpu.pipeline_mode<synchronous>, transform_indices = @transform_7, window_bounds = array<i64: 16, 128>}]} {
    %cst = arith.constant 0.000000e+00 : f32
    %0 = vector.broadcast %cst : f32 to vector<16x2048xf32>
    %c0 = arith.constant 0 : index
    %c0_0 = arith.constant 0 : index
    %1 = vector.load %arg1[%c0, %c0_0] : memref<16x768xf32, #tpu.memory_space<vmem>>, vector<16x256xf32>
    %cst_1 = arith.constant dense<0.000000e+00> : vector<16xf32>
    %2 = vector.multi_reduction <add>, %1, %cst_1 [1] : vector<16x256xf32> to vector<16xf32>
    %3 = vector.shape_cast %2 : vector<16xf32> to vector<16x1xf32>
    %c0_2 = arith.constant 0 : index
    %c0_3 = arith.constant 0 : index
    %4 = vector.load %arg2[%c0_2, %c0_3] : memref<3x2048xf32, #tpu.memory_space<vmem>>, vector<1x2048xf32>
    %5 = vector.broadcast %3 : vector<16x1xf32> to vector<16x2048xf32>
    %6 = vector.broadcast %4 : vector<1x2048xf32> to vector<16x2048xf32>
    %7 = arith.mulf %5, %6 : vector<16x2048xf32>
    %8 = arith.addf %0, %7 : vector<16x2048xf32>
    %c0_4 = arith.constant 0 : index
    %c256 = arith.constant 256 : index
    %9 = vector.load %arg1[%c0_4, %c256] : memref<16x768xf32, #tpu.memory_space<vmem>>, vector<16x256xf32>
    %cst_5 = arith.constant dense<0.000000e+00> : vector<16xf32>
    %10 = vector.multi_reduction <add>, %9, %cst_5 [1] : vector<16x256xf32> to vector<16xf32>
    %11 = vector.shape_cast %10 : vector<16xf32> to vector<16x1xf32>
    %c1 = arith.constant 1 : index
    %c0_6 = arith.constant 0 : index
    %12 = vector.load %arg2[%c1, %c0_6] : memref<3x2048xf32, #tpu.memory_space<vmem>>, vector<1x2048xf32>
    %13 = vector.broadcast %11 : vector<16x1xf32> to vector<16x2048xf32>
    %14 = vector.broadcast %12 : vector<1x2048xf32> to vector<16x2048xf32>
    %15 = arith.mulf %13, %14 : vector<16x2048xf32>
    %16 = arith.addf %8, %15 : vector<16x2048xf32>
    %c0_7 = arith.constant 0 : index
    %c512 = arith.constant 512 : index
    %17 = vector.load %arg1[%c0_7, %c512] : memref<16x768xf32, #tpu.memory_space<vmem>>, vector<16x256xf32>
    %cst_8 = arith.constant dense<0.000000e+00> : vector<16xf32>
    %18 = vector.multi_reduction <add>, %17, %cst_8 [1] : vector<16x256xf32> to vector<16xf32>
    %19 = vector.shape_cast %18 : vector<16xf32> to vector<16x1xf32>
    %c2 = arith.constant 2 : index
    %c0_9 = arith.constant 0 : index
    %20 = vector.load %arg2[%c2, %c0_9] : memref<3x2048xf32, #tpu.memory_space<vmem>>, vector<1x2048xf32>
    %21 = vector.broadcast %19 : vector<16x1xf32> to vector<16x2048xf32>
    %22 = vector.broadcast %20 : vector<1x2048xf32> to vector<16x2048xf32>
    %23 = arith.mulf %21, %22 : vector<16x2048xf32>
    %24 = arith.addf %16, %23 : vector<16x2048xf32>
    %c0_10 = arith.constant 0 : index
    %c0_11 = arith.constant 0 : index
    %25 = vector.load %arg3[%c0_10, %c0_11] : memref<1x2048xf32, #tpu.memory_space<vmem>>, vector<1x2048xf32>
    %26 = vector.broadcast %25 : vector<1x2048xf32> to vector<16x2048xf32>
    %27 = arith.addf %24, %26 : vector<16x2048xf32>
    %cst_12 = arith.constant 0.000000e+00 : f32
    %28 = vector.broadcast %cst_12 : f32 to vector<16x2048xf32>
    %29 = arith.maximumf %27, %28 : vector<16x2048xf32>
    %c0_13 = arith.constant 0 : index
    %c0_14 = arith.constant 0 : index
    %30 = vector.load %arg4[%c0_13, %c0_14] : memref<2048x128xf32, #tpu.memory_space<vmem>>, vector<2048x128xf32>
    %cst_15 = arith.constant dense<0.000000e+00> : vector<16x128xf32>
    %31 = tpu.matmul %29, %30, %cst_15 {dimension_numbers = #tpu.dot_dimension_numbers<[1], [0], [0], [1], [0, 0, 1, 1], [], []>} : vector<16x2048xf32>, vector<2048x128xf32>, vector<16x128xf32> -> vector<16x128xf32>
    %c0_16 = arith.constant 0 : index
    %c0_17 = arith.constant 0 : index
    %32 = vector.load %arg5[%c0_16, %c0_17] : memref<1x128xf32, #tpu.memory_space<vmem>>, vector<1x128xf32>
    %33 = vector.broadcast %32 : vector<1x128xf32> to vector<16x128xf32>
    %34 = arith.addf %31, %33 : vector<16x128xf32>
    %c0_18 = arith.constant 0 : index
    %c0_19 = arith.constant 0 : index
    %35 = vector.load %arg6[%c0_18, %c0_19] : memref<128x128xf32, #tpu.memory_space<vmem>>, vector<128x128xf32>
    %cst_20 = arith.constant dense<0.000000e+00> : vector<16x128xf32>
    %36 = tpu.matmul %34, %35, %cst_20 {dimension_numbers = #tpu.dot_dimension_numbers<[1], [0], [0], [1], [0, 0, 1, 1], [], []>} : vector<16x128xf32>, vector<128x128xf32>, vector<16x128xf32> -> vector<16x128xf32>
    %c0_21 = arith.constant 0 : index
    %c0_22 = arith.constant 0 : index
    %37 = vector.load %arg7[%c0_21, %c0_22] : memref<1x128xf32, #tpu.memory_space<vmem>>, vector<1x128xf32>
    %38 = vector.broadcast %37 : vector<1x128xf32> to vector<16x128xf32>
    %39 = arith.addf %36, %38 : vector<16x128xf32>
    %cst_23 = arith.constant dense<0xFF800000> : vector<16xf32>
    %40 = vector.multi_reduction <maximumf>, %39, %cst_23 [1] : vector<16x128xf32> to vector<16xf32>
    %41 = vector.shape_cast %40 : vector<16xf32> to vector<16x1xf32>
    %42 = vector.broadcast %41 : vector<16x1xf32> to vector<16x128xf32>
    %43 = arith.subf %39, %42 : vector<16x128xf32>
    %44 = math.exp %43 : vector<16x128xf32>
    %cst_24 = arith.constant dense<0.000000e+00> : vector<16xf32>
    %45 = vector.multi_reduction <add>, %44, %cst_24 [1] : vector<16x128xf32> to vector<16xf32>
    %46 = vector.shape_cast %45 : vector<16xf32> to vector<16x1xf32>
    %47 = tpu.reciprocal %46 : vector<16x1xf32> -> vector<16x1xf32>
    %48 = vector.broadcast %47 : vector<16x1xf32> to vector<16x128xf32>
    %49 = arith.mulf %44, %48 : vector<16x128xf32>
    %c0_25 = arith.constant 0 : index
    %c0_26 = arith.constant 0 : index
    %50 = vector.load %arg8[%c0_25, %c0_26] : memref<16x128xf32, #tpu.memory_space<vmem>>, vector<16x128xf32>
    tpu.vector_store %arg8[%c0_25, %c0_26], %49 {strides = array<i32>} : memref<16x128xf32, #tpu.memory_space<vmem>>, vector<16x128xf32>,
    return
  }
  func.func @transform_0(%arg0: i32) -> (i32, i32) {
    %c0_i32 = arith.constant 0 : i32
    %c0_i32_0 = arith.constant 0 : i32
    %c0_i32_1 = arith.constant 0 : i32
    return %c0_i32, %c0_i32_0 : i32, i32
  }
  func.func @transform_1(%arg0: i32) -> (i32, i32) {
    %c0_i32 = arith.constant 0 : i32
    %c0_i32_0 = arith.constant 0 : i32
    %c0_i32_1 = arith.constant 0 : i32
    return %c0_i32, %c0_i32_0 : i32, i32
  }
  func.func @transform_2(%arg0: i32) -> (i32, i32) {
    %c0_i32 = arith.constant 0 : i32
    %c0_i32_0 = arith.constant 0 : i32
    %c0_i32_1 = arith.constant 0 : i32
    return %c0_i32, %c0_i32_0 : i32, i32
  }
  func.func @transform_3(%arg0: i32) -> (i32, i32) {
    %c0_i32 = arith.constant 0 : i32
    %c0_i32_0 = arith.constant 0 : i32
    %c0_i32_1 = arith.constant 0 : i32
    return %c0_i32, %c0_i32_0 : i32, i32
  }
  func.func @transform_4(%arg0: i32) -> (i32, i32) {
    %c0_i32 = arith.constant 0 : i32
    %c0_i32_0 = arith.constant 0 : i32
    %c0_i32_1 = arith.constant 0 : i32
    return %c0_i32, %c0_i32_0 : i32, i32
  }
  func.func @transform_5(%arg0: i32) -> (i32, i32) {
    %c0_i32 = arith.constant 0 : i32
    %c0_i32_0 = arith.constant 0 : i32
    %c0_i32_1 = arith.constant 0 : i32
    return %c0_i32, %c0_i32_0 : i32, i32
  }
  func.func @transform_6(%arg0: i32) -> (i32, i32) {
    %c0_i32 = arith.constant 0 : i32
    %c0_i32_0 = arith.constant 0 : i32
    %c0_i32_1 = arith.constant 0 : i32
    return %c0_i32, %c0_i32_0 : i32, i32
  }
  func.func @transform_7(%arg0: i32) -> (i32, i32) {
    %c0_i32 = arith.constant 0 : i32
    %c0_i32_0 = arith.constant 0 : i32
    %c0_i32_1 = arith.constant 0 : i32
    return %c0_i32, %c0_i32_0 : i32, i32
  }
}

</mosaic_0001>

<bundles_post_ra>
// kernel: _lambda_.1
= control target key start
LH: loop header
LB: loop body
LE: loop exit
PB: predicated region body
PF: predicated region fallthrough
CT: control target
= control target key end

     0   :  { %12 = vsyncpa [#allocation3], 0  ;;  %s2340_s24 = smov [#allocation2]   ;;  %s3471_s0 = inlined_call_operand.vmem [shape: f32[16,768], index: 0, kind: input, shape index: {}]   ;;  %s3472_s1 = inlined_call_operand.vmem [shape: f32[3,2048], index: 1, kind: input, shape index: {}]   ;;  %s3473_s2 = inlined_call_operand.vmem [shape: f32[1,2048], index: 2, kind: input, shape index: {}]   ;;  %s3474_s3 = inlined_call_operand.hbm [shape: f32[2048,128], index: 3, kind: input, shape index: {}]   ;;  %s3475_s4 = inlined_call_operand.vmem [shape: f32[1,128], index: 4, kind: input, shape index: {}]   ;;  %s3476_s5 = inlined_call_operand.vmem [shape: f32[128,128], index: 5, kind: input, shape index: {}]   ;;  %s3477_s6 = inlined_call_operand.vmem [shape: f32[1,128], index: 6, kind: input, shape index: {}]   ;;  %s3478_s7 = inlined_call_operand.vmem [shape: f32[16,128], index: 7, kind: output, shape index: {}]  }
   0x1   :  { %s24_s25 = sshll.u32 %s2340_s24, 4  ;;  %s2316_s28 = scalar_lea.hbm %s3474_s3, 32768  ;;  %s25_s25 = int_to_ptr.vmem [resolvable:$true] %s24_s25 }
   0x2   :  { %p2317_p0 = scmp.ne.s32.totalorder %s3474_s3, %s2316_s28  ;;  %p2320_p1 = scmp.lt.u32.totalorder %s2316_s28, %s3474_s3 }
   0x4   :  { %p2322_p2 = pnand %p2320_p1, %p2317_p0 }
   0x6   :  { %2325 = shalt.err (!%p2322_p2)
}
   0x7   :  { %s2326_s10 = scalar_lea.vmem %s25_s25, 32768  ;;  %p2331_p4 = scmp.lt.s32.totalorder %s25_s25, %s25_s25 }
   0x8   :  { %p2327_p3 = scmp.ne.s32.totalorder %s25_s25, %s2326_s10  ;;  %p2332_p5 = scmp.lt.s32.totalorder %s2326_s10, %s2326_s10 }
   0xa   :  { %p2333_p6 = por %p2332_p5, %p2331_p4 }
   0xc   :  { %p2334_p7 = pnand %p2333_p6, %p2327_p3 }
   0xe   :  { %2337 = shalt.err (!%p2334_p7)
}
   0xf   :  { %s2341_s11 = smov 128   ;;  %s2342_s12 = smov 8  }
  0x10   :  { %30 = dma.hbm_to_vmem [thread:$0]  %s3474_s3, 32768, %s25_s25, [#allocation3], %s2341_s11, %s2341_s11, %s2342_s12  }
  0x11   :  { %2338 = dma.done.wait [#allocation3], 32768  }
  0x12   :  { %2339 = vsyncadd [#allocation3], 4294934528  ;;  %v40_v0 = vld [vmem:[%s3471_s0] sm:$0xff]  ;;  %v41_v1 = vld [vmem:[%s3471_s0 + $0x8] sm:$0xff] }
  0x13   :  { %v359_v2 = vld [vmem:[%s3471_s0 + $0x20] sm:$0xff]  ;;  %v44_v3 = vadd.f32 %v41_v1, %v40_v0  ;;  %v360_v4 = vld [vmem:[%s3471_s0 + $0x28] sm:$0xff]  ;;  %v199_v5 = vld [vmem:[%s3471_s0 + $0x10] sm:$0xff] }
  0x14   :  { %v200_v6 = vld [vmem:[%s3471_s0 + $0x18] sm:$0xff]  ;;  %v363_v7 = vadd.f32 %v360_v4, %v359_v2  ;;  %v42_v8 = vld [vmem:[%s3471_s0 + $0x30] sm:$0xff]  ;;  %v201_v10 = vld [vmem:[%s3471_s0 + $0x40] sm:$0xff] }
  0x15   :  { %v43_v9 = vld [vmem:[%s3471_s0 + $0x38] sm:$0xff]  ;;  %45 = vadd.xlane.f32.xlu0 %v44_v3  ;;  %v203_v11 = vadd.f32 %v200_v6, %v199_v5  ;;  %v202_v12 = vld [vmem:[%s3471_s0 + $0x48] sm:$0xff]  ;;  %v361_v13 = vld [vmem:[%s3471_s0 + $0x50] sm:$0xff] }
  0x16   :  { %v362_v14 = vld [vmem:[%s3471_s0 + $0x58] sm:$0xff]  ;;  %364 = vadd.xlane.f32.xlu1 %v363_v7  ;;  %v47_v15 = vadd.f32 %v43_v9, %v42_v8  ;;  %v683_v16 = vld [vmem:[#allocation2 + $0x80] sm:$0xff]  ;;  %v684_v17 = vld [vmem:[#allocation2 + $0x88] sm:$0xff]  ;;  %v206_v28 = vadd.f32 %v202_v12, %v201_v10 }
  0x17   :  { %v715_v18 = vld [vmem:[#allocation2 + $0x180] sm:$0xff]  ;;  %v2017_v19 = vpack.c.bf16 %v684_v17, %v683_v16  ;;  %v716_v20 = vld [vmem:[#allocation2 + $0x188] sm:$0xff]  ;;  %v685_v27 = vld [vmem:[#allocation2 + $0x90] sm:$0xff]  ;;  %v366_v33 = vadd.f32 %v362_v14, %v361_v13 }
  0x18   :  { %v667_v21 = vld [vmem:[#allocation2] sm:$0xff]  ;;  %v668_v22 = vld [vmem:[#allocation2 + $0x8] sm:$0xff]  ;;  %v2049_v23 = vpack.c.bf16 %v716_v20, %v715_v18  ;;  %v686_v30 = vld [vmem:[#allocation2 + $0x98] sm:$0xff] }
  0x19   :  { %v2019_v24 = vpack.c.bf16 %v668_v22, %v667_v21  ;;  %v699_v25 = vld [vmem:[#allocation2 + $0x100] sm:$0xff]  ;;  %v700_v26 = vld [vmem:[#allocation2 + $0x108] sm:$0xff]  ;;  %204 = vadd.xlane.f32.xlu0 %v203_v11  ;;  %2018 = vmatprep.subr.bf16.mxu0 %v2017_v19  ;;  %v717_v31 = vld [vmem:[#allocation2 + $0x190] sm:$0xff]  ;;  %v2021_v34 = vpack.c.bf16 %v686_v30, %v685_v27 }
  0x1a   :  { %v2051_v29 = vpack.c.bf16 %v700_v26, %v699_v25  ;;  %v718_v32 = vld [vmem:[#allocation2 + $0x198] sm:$0xff]  ;;  %48 = vadd.xlane.f32.xlu1 %v47_v15  ;;  %2050 = vmatprep.subr.bf16.mxu1 %v2049_v23  ;;  %v669_v36 = vld [vmem:[#allocation2 + $0x10] sm:$0xff]  ;;  %v687_v41 = vld [vmem:[#allocation2 + $0xa0] sm:$0xff] }
  0x1b   :  { %v2053_v35 = vpack.c.bf16 %v718_v32, %v717_v31  ;;  %v670_v37 = vld [vmem:[#allocation2 + $0x18] sm:$0xff]  ;;  %v701_v38 = vld [vmem:[#allocation2 + $0x110] sm:$0xff]  ;;  %2020 = vmatpush3.bf16.msra.mxu0 %v2019_v24  ;;  %v688_v42 = vld [vmem:[#allocation2 + $0xa8] sm:$0xff] }
  0x1c   :  { %2052 = vmatpush3.bf16.msra.mxu1 %v2051_v29  ;;  %v2023_v39 = vpack.c.bf16 %v670_v37, %v669_v36  ;;  %v702_v40 = vld [vmem:[#allocation2 + $0x118] sm:$0xff]  ;;  %2022 = vmatprep.subr.bf16.mxu0 %v2021_v34  ;;  %v2025_v44 = vpack.c.bf16 %v688_v42, %v687_v41  ;;  %v719_v45 = vld [vmem:[#allocation2 + $0x1a0] sm:$0xff]  ;;  %v720_v46 = vld [vmem:[#allocation2 + $0x1a8] sm:$0xff] }
  0x1d   :  { %2054 = vmatprep.subr.bf16.mxu1 %v2053_v35  ;;  %v2055_v43 = vpack.c.bf16 %v702_v40, %v701_v38  ;;  %v671_v47 = vld [vmem:[#allocation2 + $0x20] sm:$0xff]  ;;  %207 = vadd.xlane.f32.xlu0 %v206_v28  ;;  %v2057_v48 = vpack.c.bf16 %v720_v46, %v719_v45  ;;  %v672_v49 = vld [vmem:[#allocation2 + $0x28] sm:$0xff]  ;;  %v689_v52 = vld [vmem:[#allocation2 + $0xb0] sm:$0xff] }
  0x1e   :  { %v703_v50 = vld [vmem:[#allocation2 + $0x120] sm:$0xff]  ;;  %v704_v51 = vld [vmem:[#allocation2 + $0x128] sm:$0xff]  ;;  %367 = vadd.xlane.f32.xlu1 %v366_v33  ;;  %v690_v53 = vld [vmem:[#allocation2 + $0xb8] sm:$0xff]  ;;  %v2027_v55 = vpack.c.bf16 %v672_v49, %v671_v47 }
  0x1f   :  { %v721_v54 = vld [vmem:[#allocation2 + $0x1b0] sm:$0xff]  ;;  %2024 = vmatpush3.bf16.msra.mxu0 %v2023_v39  ;;  %v2059_v56 = vpack.c.bf16 %v704_v51, %v703_v50  ;;  %v722_v57 = vld [vmem:[#allocation2 + $0x1b8] sm:$0xff]  ;;  %v2029_v60 = vpack.c.bf16 %v690_v53, %v689_v52  ;;  %v691_v0 = vld [vmem:[#allocation2 + $0xc0] sm:$0xff] }
  0x20   :  { %2056 = vmatpush3.bf16.msra.mxu1 %v2055_v43  ;;  %v673_v58 = vld [vmem:[#allocation2 + $0x30] sm:$0xff]  ;;  %v674_v59 = vld [vmem:[#allocation2 + $0x38] sm:$0xff]  ;;  %2026 = vmatprep.subr.bf16.mxu0 %v2025_v44  ;;  %v2061_v61 = vpack.c.bf16 %v722_v57, %v721_v54  ;;  %v692_v1 = vld [vmem:[#allocation2 + $0xc8] sm:$0xff] }
  0x21   :  { %2058 = vmatprep.subr.bf16.mxu1 %v2057_v48  ;;  %v705_v62 = vld [vmem:[#allocation2 + $0x130] sm:$0xff]  ;;  %v706_v63 = vld [vmem:[#allocation2 + $0x138] sm:$0xff]  ;;  %v723_v2 = vld [vmem:[#allocation2 + $0x1c0] sm:$0xff]  ;;  %v2031_v4 = vpack.c.bf16 %v674_v59, %v673_v58  ;;  %v2033_v8 = vpack.c.bf16 %v692_v1, %v691_v0 }
  0x22   :  { %v724_v3 = vld [vmem:[#allocation2 + $0x1c8] sm:$0xff]  ;;  %v2063_v5 = vpack.c.bf16 %v706_v63, %v705_v62  ;;  %v675_v6 = vld [vmem:[#allocation2 + $0x40] sm:$0xff]  ;;  %v693_v12 = vld [vmem:[#allocation2 + $0xd0] sm:$0xff] }
  0x23   :  { %2028 = vmatpush3.bf16.msra.mxu0 %v2027_v55  ;;  %v676_v7 = vld [vmem:[#allocation2 + $0x48] sm:$0xff]  ;;  %v2065_v9 = vpack.c.bf16 %v724_v3, %v723_v2  ;;  %v707_v10 = vld [vmem:[#allocation2 + $0x140] sm:$0xff]  ;;  %v694_v13 = vld [vmem:[#allocation2 + $0xd8] sm:$0xff] }
  0x24   :  { %2060 = vmatpush3.bf16.msra.mxu1 %v2059_v56  ;;  %2030 = vmatprep.subr.bf16.mxu0 %v2029_v60  ;;  %v708_v11 = vld [vmem:[#allocation2 + $0x148] sm:$0xff]  ;;  %v725_v14 = vld [vmem:[#allocation2 + $0x1d0] sm:$0xff]  ;;  %v726_v15 = vld [vmem:[#allocation2 + $0x1d8] sm:$0xff]  ;;  %v2035_v16 = vpack.c.bf16 %v676_v7, %v675_v6  ;;  %v2037_v20 = vpack.c.bf16 %v694_v13, %v693_v12  ;;  %v55_v56 = vlaneseq }
  0x25   :  { %2062 = vmatprep.subr.bf16.mxu1 %v2061_v61  ;;  %v2067_v17 = vpack.c.bf16 %v708_v11, %v707_v10  ;;  %v677_v18 = vld [vmem:[#allocation2 + $0x50] sm:$0xff]  ;;  %v678_v19 = vld [vmem:[#allocation2 + $0x58] sm:$0xff]  ;;  %v2069_v21 = vpack.c.bf16 %v726_v15, %v725_v14  ;;  %v695_v24 = vld [vmem:[#allocation2 + $0xe0] sm:$0xff] }
  0x26   :  { %v709_v22 = vld [vmem:[#allocation2 + $0x150] sm:$0xff]  ;;  %v710_v23 = vld [vmem:[#allocation2 + $0x158] sm:$0xff]  ;;  %v696_v25 = vld [vmem:[#allocation2 + $0xe8] sm:$0xff]  ;;  %v2039_v28 = vpack.c.bf16 %v678_v19, %v677_v18  ;;  %v56_v57 = vshrl.u32 %v55_v56, 7 }
  0x27   :  { %2032 = vmatpush3.bf16.msra.mxu0 %v2031_v4  ;;  %v727_v26 = vld [vmem:[#allocation2 + $0x1e0] sm:$0xff]  ;;  %v728_v27 = vld [vmem:[#allocation2 + $0x1e8] sm:$0xff]  ;;  %v2071_v29 = vpack.c.bf16 %v710_v23, %v709_v22  ;;  %v2041_v32 = vpack.c.bf16 %v696_v25, %v695_v24  ;;  %v697_v36 = vld [vmem:[#allocation2 + $0xf0] sm:$0xff] }
  0x28   :  { %2064 = vmatpush3.bf16.msra.mxu1 %v2063_v5  ;;  %2034 = vmatprep.subr.bf16.mxu0 %v2033_v8  ;;  %v679_v30 = vld [vmem:[#allocation2 + $0x60] sm:$0xff]  ;;  %v680_v31 = vld [vmem:[#allocation2 + $0x68] sm:$0xff]  ;;  %v2073_v33 = vpack.c.bf16 %v728_v27, %v727_v26  ;;  %v698_v37 = vld [vmem:[#allocation2 + $0xf8] sm:$0xff]  ;;  %v2431_v58 = vsub.s32 1, %v56_v57  ;;  %v2433_v59 = vsub.s32 3, %v56_v57  ;;  %v2440_v61 = vsub.s32 0, %v56_v57 }
  0x29   :  { %2066 = vmatprep.subr.bf16.mxu1 %v2065_v9  ;;  %v711_v34 = vld [vmem:[#allocation2 + $0x160] sm:$0xff]  ;;  %v712_v35 = vld [vmem:[#allocation2 + $0x168] sm:$0xff]  ;;  %v729_v38 = vld [vmem:[#allocation2 + $0x1f0] sm:$0xff]  ;;  %v2043_v40 = vpack.c.bf16 %v680_v31, %v679_v30  ;;  %v2045_v44 = vpack.c.bf16 %v698_v37, %v697_v36  ;;  %v2452_v0 = vsub.s32 2, %v56_v57  ;;  %v2454_v1 = vsub.s32 5, %v56_v57 }
  0x2a   :  { %v730_v39 = vld [vmem:[#allocation2 + $0x1f8] sm:$0xff]  ;;  %v2075_v41 = vpack.c.bf16 %v712_v35, %v711_v34  ;;  %v681_v42 = vld [vmem:[#allocation2 + $0x70] sm:$0xff]  ;;  %v747_v48 = vld [vmem:[#allocation2 + $0x280] sm:$0xff]  ;;  %v2469_v5 = vsub.s32 7, %v56_v57  ;;  %v2471_v6 = vsub.s32 4, %v56_v57 }
  0x2b   :  { %2036 = vmatpush3.bf16.msra.mxu0 %v2035_v16  ;;  %v682_v43 = vld [vmem:[#allocation2 + $0x78] sm:$0xff]  ;;  %v2077_v45 = vpack.c.bf16 %v730_v39, %v729_v38  ;;  %v713_v46 = vld [vmem:[#allocation2 + $0x170] sm:$0xff]  ;;  %v748_v49 = vld [vmem:[#allocation2 + $0x288] sm:$0xff]  ;;  %v2505_v16 = vsub.s32 6, %v56_v57 }
  0x2c   :  { %2068 = vmatpush3.bf16.msra.mxu1 %v2067_v17  ;;  %2038 = vmatprep.subr.bf16.mxu0 %v2037_v20  ;;  %v714_v47 = vld [vmem:[#allocation2 + $0x178] sm:$0xff]  ;;  %v779_v50 = vld [vmem:[#allocation2 + $0x380] sm:$0xff]  ;;  %v780_v51 = vld [vmem:[#allocation2 + $0x388] sm:$0xff]  ;;  %v2047_v52 = vpack.c.bf16 %v682_v43, %v681_v42  ;;  %v2081_v54 = vpack.c.bf16 %v748_v49, %v747_v48 }
  0x2d   :  { %2070 = vmatprep.subr.bf16.mxu1 %v2069_v21  ;;  %v2079_v53 = vpack.c.bf16 %v714_v47, %v713_v46  ;;  %v2113_v55 = vpack.c.bf16 %v780_v51, %v779_v50  ;;  %v2438_v60 = vld [vmem:[%s3472_s1] ss:$4 sm:$0xff]  ;;  %v2445_v62 = vld [vmem:[%s3472_s1 + $0x1] ss:$4 sm:$0xff]  ;;  %v2450_v63 = vld [vmem:[%s3472_s1 + $0x2] ss:$4 sm:$0xff] }
  0x2e   :  { %v2458_v2 = vrot.slane %v2438_v60, %v2431_v58  ;;  %v2463_v3 = vld [vmem:[%s3473_s2] sm:$0xff]  ;;  %v2467_v4 = vrot.slane %v2438_v60, %v2433_v59  ;;  %v2475_v7 = vrot.slane %v2445_v62, %v2431_v58  ;;  %v2479_v8 = vrot.slane %v2450_v63, %v2431_v58  ;;  %v2503_v15 = vld [vmem:[#allocation2 + $0x208] sm:$0xff]  ;;  %v2527_v23 = vld [vmem:[#allocation2 + $0x290] sm:$0xff] }
  0x2f   :  { %2040 = vmatpush3.bf16.msra.mxu0 %v2039_v28  ;;  %v2483_v9 = vrot.slane %v2445_v62, %v2433_v59  ;;  %v2487_v10 = vrot.slane %v2438_v60, %v2440_v61  ;;  %v2491_v11 = vrot.slane %v2450_v63, %v2433_v59  ;;  %v2495_v12 = vrot.slane %v2445_v62, %v2440_v61  ;;  %v2501_v14 = vld [vmem:[#allocation2 + $0x200] sm:$0xff]  ;;  %v2525_v22 = vld [vmem:[#allocation2 + $0x308] sm:$0xff]  ;;  %v2541_v27 = vld [vmem:[#allocation2 + $0x298] sm:$0xff] }
  0x30   :  { %2072 = vmatpush3.bf16.msra.mxu1 %v2071_v29  ;;  %2042 = vmatprep.subr.bf16.mxu0 %v2041_v32  ;;  %v2499_v13 = vrot.slane %v2450_v63, %v2440_v61  ;;  %3586 = vst [vmem:[#allocation5_spill] sm:$0xff] %v2501_v14  ;;  %3587 = vst [vmem:[#allocation6_spill] sm:$0xff] %v2503_v15  ;;  %v2509_v17 = vrot.slane %v2463_v3, %v2431_v58  ;;  %v2523_v21 = vld [vmem:[#allocation2 + $0x300] sm:$0xff]  ;;  %v2543_v28 = vld [vmem:[#allocation2 + $0x390] sm:$0xff] }
  0x31   :  { %2074 = vmatprep.subr.bf16.mxu1 %v2073_v33  ;;  %v2513_v18 = vrot.slane %v2463_v3, %v2433_v59  ;;  %v2517_v19 = vrot.slane %v2463_v3, %v2440_v61  ;;  %v2521_v20 = vrot.slane %v2438_v60, %v2452_v0  ;;  %3591 = vst [vmem:[#allocation10_spill] sm:$0xff] %v2523_v21  ;;  %3592 = vst [vmem:[#allocation11_spill] sm:$0xff] %v2525_v22  ;;  %v2545_v29 = vld [vmem:[#allocation2 + $0x398] sm:$0xff]  ;;  %v2558_v33 = vld [vmem:[#allocation2 + $0x210] sm:$0xff] }
  0x32   :  { %3588 = vst [vmem:[#allocation7_spill] sm:$0xff] %v2509_v17  ;;  %3593 = vst [vmem:[#allocation12_spill] sm:$0xff] %v2527_v23  ;;  %v2531_v24 = vrot.slane %v2445_v62, %v2452_v0  ;;  %v2535_v25 = vrot.slane %v2450_v63, %v2452_v0  ;;  %v2539_v26 = vrot.slane %v2463_v3, %v2452_v0  ;;  %v2554_v31 = vld [vmem:[%s3472_s1 + $0x20] ss:$4 sm:$0xff] }
  0x33   :  { %2044 = vmatpush3.bf16.msra.mxu0 %v2043_v40  ;;  %3589 = vst [vmem:[#allocation8_spill] sm:$0xff] %v2513_v18  ;;  %3590 = vst [vmem:[#allocation9_spill] sm:$0xff] %v2517_v19  ;;  %v2549_v30 = vrot.slane %v2438_v60, %v2454_v1  ;;  %v2560_v34 = vld [vmem:[#allocation2 + $0x218] sm:$0xff]  ;;  %v2562_v35 = vld [vmem:[#allocation2 + $0x310] sm:$0xff]  ;;  %v2568_v37 = vrot.slane %v2445_v62, %v2454_v1  ;;  %v2572_v38 = vrot.slane %v2450_v63, %v2454_v1 }
  0x34   :  { %2076 = vmatpush3.bf16.msra.mxu1 %v2075_v41  ;;  %2046 = vmatprep.subr.bf16.mxu0 %v2045_v44  ;;  %3594 = vst [vmem:[#allocation13_spill] sm:$0xff] %v2539_v26  ;;  %3595 = vst [vmem:[#allocation14_spill] sm:$0xff] %v2541_v27  ;;  %v2564_v36 = vld [vmem:[#allocation2 + $0x318] sm:$0xff]  ;;  %v2576_v39 = vrot.slane %v2438_v60, %v2469_v5  ;;  %v2578_v40 = vld [vmem:[#allocation2 + $0x2a0] sm:$0xff]  ;;  %v2586_v43 = vrot.slane %v2445_v62, %v2469_v5 }
  0x35   :  { %2078 = vmatprep.subr.bf16.mxu1 %v2077_v45  ;;  %3596 = vst [vmem:[#allocation15_spill] sm:$0xff] %v2543_v28  ;;  %3597 = vst [vmem:[#allocation16_spill] sm:$0xff] %v2545_v29  ;;  %v2580_v41 = vld [vmem:[#allocation2 + $0x2a8] sm:$0xff]  ;;  %v2590_v44 = vrot.slane %v2450_v63, %v2469_v5  ;;  %v2592_v45 = vld [vmem:[#allocation2 + $0x3a0] sm:$0xff]  ;;  %v2606_v51 = vrot.slane %v2438_v60, %v2471_v6  ;;  %v2622_v42 = vrot.slane %v2445_v62, %v2471_v6 }
  0x36   :  { %3598 = vst [vmem:[#allocation17_spill] sm:$0xff] %v2576_v39  ;;  %3599 = vst [vmem:[#allocation18_spill] sm:$0xff] %v2578_v40  ;;  %v2594_v46 = vld [vmem:[#allocation2 + $0x3a8] sm:$0xff]  ;;  %v2596_v47 = vld [vmem:[#allocation2 + $0x220] sm:$0xff]  ;;  %v2626_v32 = vrot.slane %v2450_v63, %v2471_v6  ;;  %v2634_v21 = vrot.slane %v2445_v62, %v2505_v16  ;;  %v2640_v14 = vrot.slane %v2463_v3, %v2454_v1 }
  0x37   :  { %2048 = vmatpush3.bf16.msra.mxu0 %v2047_v52  ;;  %3600 = vst [vmem:[#allocation19_spill] sm:$0xff] %v2586_v43  ;;  %3601 = vst [vmem:[#allocation20_spill] sm:$0xff] %v2590_v44  ;;  %v2598_v48 = vld [vmem:[#allocation2 + $0x228] sm:$0xff]  ;;  %v2600_v49 = vld [vmem:[#allocation2 + $0x320] sm:$0xff]  ;;  %v2660_v22 = vrot.slane %v2450_v63, %v2505_v16  ;;  %v2676_v18 = vrot.slane %v2463_v3, %v2471_v6  ;;  %v2680_v63 = vrot.slane %v2463_v3, %v2505_v16 }
  0x38   :  { %2080 = vmatpush3.bf16.msra.mxu1 %v2079_v53  ;;  %2082 = vmatprep.subr.bf16.mxu0 %v2081_v54  ;;  %3602 = vst [vmem:[#allocation21_spill] sm:$0xff] %v2600_v49  ;;  %v2602_v50 = vld [vmem:[#allocation2 + $0x328] sm:$0xff]  ;;  %3604 = vst [vmem:[#allocation23_spill] sm:$0xff] %v2606_v51  ;;  %v2608_v52 = vld [vmem:[#allocation2 + $0x2b0] sm:$0xff]  ;;  %v2630_v51 = vrot.slane %v2438_v60, %v2505_v16 }
  0x39   :  { %2114 = vmatprep.subr.bf16.mxu1 %v2113_v55  ;;  %3603 = vst [vmem:[#allocation22_spill] sm:$0xff] %v2602_v50  ;;  %3605 = vst [vmem:[#allocation24_spill] sm:$0xff] %v2608_v52  ;;  %v2610_v53 = vld [vmem:[#allocation2 + $0x2b8] sm:$0xff]  ;;  %v2612_v54 = vld [vmem:[#allocation2 + $0x3b0] sm:$0xff]  ;;  %v2757_v52 = vrot.slane %v2554_v31, %v2454_v1 }
  0x3a   :  { %3606 = vst [vmem:[#allocation25_spill] sm:$0xff] %v2612_v54  ;;  %v2614_v55 = vld [vmem:[#allocation2 + $0x3b8] sm:$0xff]  ;;  %v2616_v56 = vld [vmem:[#allocation2 + $0x230] sm:$0xff]  ;;  %3610 = vst [vmem:[#allocation29_spill] sm:$0xff] %v2622_v42  ;;  %v2644_v42 = vrot.slane %v2463_v3, %v2469_v5  ;;  %v2700_v3 = vrot.slane %v2554_v31, %v2433_v59 }
  0x3b   :  { %3607 = vst [vmem:[#allocation26_spill] sm:$0xff] %v2614_v55  ;;  %3608 = vst [vmem:[#allocation27_spill] sm:$0xff] %v2616_v56  ;;  %v2618_v57 = vld [vmem:[#allocation2 + $0x238] sm:$0xff]  ;;  %v2650_v60 = vld [vmem:[#allocation2 + $0x2c0] sm:$0xff] }
  0x3c   :  { %3609 = vst [vmem:[#allocation28_spill] sm:$0xff] %v2618_v57  ;;  %3611 = vst [vmem:[#allocation30_spill] sm:$0xff] %v2626_v32  ;;  %v2646_v32 = vld [vmem:[#allocation2 + $0x330] sm:$0xff]  ;;  %v2648_v15 = vld [vmem:[#allocation2 + $0x338] sm:$0xff] }
  0x3d   :  { %3612 = vst [vmem:[#allocation31_spill] sm:$0xff] %v2630_v51  ;;  %3613 = vst [vmem:[#allocation32_spill] sm:$0xff] %v2634_v21  ;;  %v2652_v51 = vld [vmem:[#allocation2 + $0x2c8] sm:$0xff]  ;;  %v2654_v62 = vld [vmem:[#allocation2 + $0x3c0] sm:$0xff] }
  0x3e   :  { %3614 = vst [vmem:[#allocation33_spill] sm:$0xff] %v2640_v14  ;;  %3615 = vst [vmem:[#allocation34_spill] sm:$0xff] %v2644_v42  ;;  %v2656_v21 = vld [vmem:[#allocation2 + $0x3c8] sm:$0xff]  ;;  %v2664_v42 = vld [vmem:[#allocation2 + $0x240] sm:$0xff]  ;;  %v2684_v14 = vrot.slane %v2554_v31, %v2431_v58 }
  0x3f   :  { %3616 = vst [vmem:[#allocation35_spill] sm:$0xff] %v2646_v32  ;;  %3617 = vst [vmem:[#allocation36_spill] sm:$0xff] %v2648_v15  ;;  %v2666_v23 = vld [vmem:[#allocation2 + $0x248] sm:$0xff]  ;;  %v2668_v27 = vld [vmem:[#allocation2 + $0x340] sm:$0xff] }
  0x40   :  { %3618 = vst [vmem:[#allocation37_spill] sm:$0xff] %v2650_v60  ;;  %3619 = vst [vmem:[#allocation38_spill] sm:$0xff] %v2652_v51  ;;  %v2670_v26 = vld [vmem:[#allocation2 + $0x348] sm:$0xff]  ;;  %v2672_v19 = vld [vmem:[#allocation2 + $0x2d0] sm:$0xff] }
  0x41   :  { %3620 = vst [vmem:[#allocation39_spill] sm:$0xff] %v2654_v62  ;;  %3621 = vst [vmem:[#allocation40_spill] sm:$0xff] %v2656_v21  ;;  %v2692_v17 = vld [vmem:[#allocation2 + $0x2d8] sm:$0xff]  ;;  %v2708_v29 = vld [vmem:[#allocation2 + $0x250] sm:$0xff] }
  0x42   :  { %3622 = vst [vmem:[#allocation41_spill] sm:$0xff] %v2660_v22  ;;  %3623 = vst [vmem:[#allocation42_spill] sm:$0xff] %v2664_v42  ;;  %v2696_v43 = vld [vmem:[#allocation2 + $0x3d8] sm:$0xff]  ;;  %v2727_v49 = vld [vmem:[#allocation2 + $0x350] sm:$0xff] }
  0x43   :  { %3624 = vst [vmem:[#allocation43_spill] sm:$0xff] %v2666_v23  ;;  %3625 = vst [vmem:[#allocation44_spill] sm:$0xff] %v2668_v27  ;;  %v2715_v40 = vld [vmem:[%s3472_s1 + $0x21] ss:$4 sm:$0xff]  ;;  %v2732_v50 = vld [vmem:[%s3472_s1 + $0x22] ss:$4 sm:$0xff] }
  0x44   :  { %3626 = vst [vmem:[#allocation45_spill] sm:$0xff] %v2670_v26  ;;  %3627 = vst [vmem:[#allocation46_spill] sm:$0xff] %v2672_v19  ;;  %v2749_v57 = vld [vmem:[#allocation2 + $0x358] sm:$0xff]  ;;  %v2751_v54 = vld [vmem:[#allocation2 + $0x2e0] sm:$0xff]  ;;  %v2783_v28 = vrot.slane %v2715_v40, %v2431_v58  ;;  %v2787_v56 = vrot.slane %v2732_v50, %v2431_v58  ;;  %v2843_v19 = vrot.slane %v2715_v40, %v2452_v0 }
  0x45   :  { %3628 = vst [vmem:[#allocation47_spill] sm:$0xff] %v2676_v18  ;;  %3629 = vst [vmem:[#allocation48_spill] sm:$0xff] %v2680_v63  ;;  %v2694_v18 = vld [vmem:[#allocation2 + $0x3d0] sm:$0xff]  ;;  %v2710_v63 = vld [vmem:[#allocation2 + $0x258] sm:$0xff] }
  0x46   :  { %3630 = vst [vmem:[#allocation49_spill] sm:$0xff] %v2684_v14  ;;  %3631 = vst [vmem:[#allocation50_spill] sm:$0xff] %v2692_v17  ;;  %v2741_v14 = vrot.slane %v2554_v31, %v2452_v0  ;;  %v2753_v55 = vld [vmem:[#allocation2 + $0x2e8] sm:$0xff]  ;;  %v2767_v62 = vld [vmem:[#allocation2 + $0x3e0] sm:$0xff]  ;;  %v2847_v17 = vrot.slane %v2732_v50, %v2452_v0 }
  0x47   :  { %3632 = vst [vmem:[#allocation51_spill] sm:$0xff] %v2694_v18  ;;  %3633 = vst [vmem:[#allocation52_spill] sm:$0xff] %v2696_v43  ;;  %v2769_v21 = vld [vmem:[#allocation2 + $0x3e8] sm:$0xff]  ;;  %v2771_v60 = vld [vmem:[#allocation2 + $0x260] sm:$0xff] }
  0x48   :  { %3634 = vst [vmem:[#allocation53_spill] sm:$0xff] %v2700_v3  ;;  %3635 = vst [vmem:[#allocation54_spill] sm:$0xff] %v2708_v29  ;;  %v2719_v3 = vrot.slane %v2554_v31, %v2440_v61  ;;  %v2775_v51 = vld [vmem:[#allocation2 + $0x268] sm:$0xff]  ;;  %v2795_v29 = vld [vmem:[#allocation2 + $0x2f0] sm:$0xff] }
  0x49   :  { %3636 = vst [vmem:[#allocation55_spill] sm:$0xff] %v2710_v63  ;;  %3638 = vst [vmem:[#allocation57_spill] sm:$0xff] %v2727_v49  ;;  %v2779_v22 = vld [vmem:[#allocation2 + $0x368] sm:$0xff]  ;;  %v2797_v63 = vld [vmem:[#allocation2 + $0x2f8] sm:$0xff] }
  0x4a   :  { %3637 = vst [vmem:[#allocation56_spill] sm:$0xff] %v2719_v3  ;;  %v2737_v3 = vld [vmem:[%s3473_s2 + $0x8] sm:$0xff]  ;;  %3639 = vst [vmem:[#allocation58_spill] sm:$0xff] %v2741_v14  ;;  %v2777_v14 = vld [vmem:[#allocation2 + $0x360] sm:$0xff] }
  0x4b   :  { %3640 = vst [vmem:[#allocation59_spill] sm:$0xff] %v2749_v57  ;;  %3641 = vst [vmem:[#allocation60_spill] sm:$0xff] %v2751_v54  ;;  %v2791_v18 = vrot.slane %v2737_v3, %v2431_v58  ;;  %v2799_v43 = vld [vmem:[#allocation2 + $0x3f0] sm:$0xff]  ;;  %v2811_v58 = vrot.slane %v2737_v3, %v2433_v59  ;;  %v2819_v57 = vld [vmem:[#allocation2 + $0x278] sm:$0xff] }
  0x4c   :  { %3642 = vst [vmem:[#allocation61_spill] sm:$0xff] %v2753_v55  ;;  %3643 = vst [vmem:[#allocation62_spill] sm:$0xff] %v2757_v52  ;;  %v2817_v49 = vld [vmem:[#allocation2 + $0x270] sm:$0xff]  ;;  %v2839_v55 = vld [vmem:[#allocation2 + $0x378] sm:$0xff] }
  0x4d   :  { %3644 = vst [vmem:[#allocation63_spill] sm:$0xff] %v2767_v62  ;;  %3645 = vst [vmem:[#allocation64_spill] sm:$0xff] %v2769_v21  ;;  %v2837_v54 = vld [vmem:[#allocation2 + $0x370] sm:$0xff]  ;;  %v2853_v52 = vld [vmem:[#allocation2 + $0x488] sm:$0xff]  ;;  %v2887_v62 = vrot.slane %v2715_v40, %v2469_v5 }
  0x4e   :  { %3646 = vst [vmem:[#allocation65_spill] sm:$0xff] %v2771_v60  ;;  %3647 = vst [vmem:[#allocation66_spill] sm:$0xff] %v2775_v51  ;;  %v2861_v60 = vrot.slane %v2554_v31, %v2469_v5  ;;  %v2865_v51 = vrot.slane %v2554_v31, %v2471_v6  ;;  %v3683_v23 = vld [vmem:[#allocation19_spill] sm:$0xff] }
  0x4f   :  { %3648 = vst [vmem:[#allocation67_spill] sm:$0xff] %v2777_v14  ;;  %3649 = vst [vmem:[#allocation68_spill] sm:$0xff] %v2779_v22  ;;  %v2891_v14 = vrot.slane %v2554_v31, %v2505_v16 }
  0x50   :  { %3650 = vst [vmem:[#allocation69_spill] sm:$0xff] %v2783_v28  ;;  %3651 = vst [vmem:[#allocation70_spill] sm:$0xff] %v2787_v56  ;;  %v2803_v28 = vrot.slane %v2715_v40, %v2433_v59  ;;  %v2807_v56 = vrot.slane %v2732_v50, %v2433_v59  ;;  %v2831_v59 = vrot.slane %v2737_v3, %v2440_v61 }
  0x51   :  { %3652 = vst [vmem:[#allocation71_spill] sm:$0xff] %v2791_v18  ;;  %3653 = vst [vmem:[#allocation72_spill] sm:$0xff] %v2795_v29  ;;  %v2815_v18 = vld [vmem:[#allocation2 + $0x3f8] sm:$0xff] }
  0x52   :  { %3654 = vst [vmem:[#allocation73_spill] sm:$0xff] %v2797_v63  ;;  %3655 = vst [vmem:[#allocation74_spill] sm:$0xff] %v2799_v43 }
  0x53   :  { %3656 = vst [vmem:[#allocation75_spill] sm:$0xff] %v2803_v28  ;;  %3657 = vst [vmem:[#allocation76_spill] sm:$0xff] %v2807_v56  ;;  %v2823_v28 = vrot.slane %v2715_v40, %v2440_v61  ;;  %v2827_v56 = vrot.slane %v2732_v50, %v2440_v61 }
  0x54   :  { %3658 = vst [vmem:[#allocation77_spill] sm:$0xff] %v2811_v58  ;;  %3659 = vst [vmem:[#allocation78_spill] sm:$0xff] %v2815_v18  ;;  %v2857_v58 = vrot.slane %v2737_v3, %v2452_v0  ;;  %v2875_v0 = vrot.slane %v2715_v40, %v2454_v1 }
  0x55   :  { %3660 = vst [vmem:[#allocation79_spill] sm:$0xff] %v2817_v49  ;;  %3661 = vst [vmem:[#allocation80_spill] sm:$0xff] %v2819_v57  ;;  %v2915_v49 = vrot.slane %v2732_v50, %v2471_v6 }
  0x56   :  { %3662 = vst [vmem:[#allocation81_spill] sm:$0xff] %v2823_v28  ;;  %3663 = vst [vmem:[#allocation82_spill] sm:$0xff] %v2827_v56 }
  0x57   :  { %3664 = vst [vmem:[#allocation83_spill] sm:$0xff] %v2831_v59  ;;  %3665 = vst [vmem:[#allocation84_spill] sm:$0xff] %v2837_v54  ;;  %v2851_v59 = vld [vmem:[#allocation2 + $0x480] sm:$0xff]  ;;  %v2903_v54 = vrot.slane %v2732_v50, %v2469_v5 }
  0x58   :  { %3666 = vst [vmem:[#allocation85_spill] sm:$0xff] %v2839_v55  ;;  %3667 = vst [vmem:[#allocation86_spill] sm:$0xff] %v2843_v19  ;;  %v2907_v55 = vrot.slane %v2715_v40, %v2471_v6 }
  0x59   :  { %3668 = vst [vmem:[#allocation87_spill] sm:$0xff] %v2847_v17  ;;  %3669 = vst [vmem:[#allocation88_spill] sm:$0xff] %v2851_v59 }
  0x5a   :  { %3670 = vst [vmem:[#allocation89_spill] sm:$0xff] %v2853_v52  ;;  %3671 = vst [vmem:[#allocation90_spill] sm:$0xff] %v2857_v58 }
  0x5b   :  { %3672 = vst [vmem:[#allocation91_spill] sm:$0xff] %v2861_v60  ;;  %3673 = vst [vmem:[#allocation92_spill] sm:$0xff] %v2865_v51  ;;  %v2883_v51 = vrot.slane %v2732_v50, %v2454_v1  ;;  %v2899_v60 = vrot.slane %v2737_v3, %v2454_v1  ;;  %v2919_v1 = vrot.slane %v2715_v40, %v2505_v16 }
  0x5c   :  { %3674 = vst [vmem:[#allocation93_spill] sm:$0xff] %v2875_v0  ;;  %3676 = vst [vmem:[#allocation95_spill] sm:$0xff] %v2887_v62 }
  0x5d   :  { %3675 = vst [vmem:[#allocation94_spill] sm:$0xff] %v2883_v51  ;;  %3677 = vst [vmem:[#allocation96_spill] sm:$0xff] %v2891_v14 }
  0x5e   :  { %3678 = vst [vmem:[#allocation97_spill] sm:$0xff] %v2899_v60  ;;  %3679 = vst [vmem:[#allocation98_spill] sm:$0xff] %v2903_v54 }
  0x5f   :  { %3680 = vst [vmem:[#allocation99_spill] sm:$0xff] %v2907_v55  ;;  %3681 = vst [vmem:[#allocation100_spill] sm:$0xff] %v2915_v49 }
  0x60   :  { %3682 = vst [vmem:[#allocation101_spill] sm:$0xff] %v2919_v1 }
  0xa2   :  { %v2877_v22 = vpop.xlane.xlu0 %45 }
  0xa3   :  { %v2893_v61 = vpop.xlane.xlu1 %364  ;;  %v136_v31 = vmul.f32 %v2458_v2, %v2877_v22  ;;  %v138_v14 = vmul.f32 %v2467_v4, %v2877_v22  ;;  %v135_v59 = vmul.f32 %v2487_v10, %v2877_v22  ;;  %v137_v52 = vmul.f32 %v2521_v20, %v2877_v22 }
  0xa4   :  { %v456_v60 = vmul.f32 %v2479_v8, %v2893_v61  ;;  %v458_v55 = vmul.f32 %v2491_v11, %v2893_v61  ;;  %v455_v49 = vmul.f32 %v2499_v13, %v2893_v61  ;;  %v457_v40 = vmul.f32 %v2535_v25, %v2893_v61 }
  0xa5   :  { %v140_v1 = vmul.f32 %v2549_v30, %v2877_v22  ;;  %v460_v57 = vmul.f32 %v2572_v38, %v2893_v61  ;;  %v142_v58 = vmul.f32 %v2576_v39, %v2877_v22  ;;  %v462_v21 = vmul.f32 %v2590_v44, %v2893_v61  ;;  %v3685_v44 = vld [vmem:[#allocation8_spill] sm:$0xff] }
  0xa6   :  { %v2929_v54 = vpop.xlane.xlu0 %204 }
  0xa7   :  { %v2939_v62 = vpop.xlane.xlu1 %48  ;;  %v296_v51 = vmul.f32 %v2475_v7, %v2929_v54  ;;  %v298_v0 = vmul.f32 %v2483_v9, %v2929_v54  ;;  %v295_v43 = vmul.f32 %v2495_v12, %v2929_v54  ;;  %v297_v18 = vmul.f32 %v2531_v24, %v2929_v54 }
  0xa8   :  { %v152_v29 = vmul.f32 %v2458_v2, %v2939_v62  ;;  %v154_v63 = vmul.f32 %v2467_v4, %v2939_v62  ;;  %v151_v42 = vmul.f32 %v2487_v10, %v2939_v62  ;;  %v153_v2 = vmul.f32 %v2521_v20, %v2939_v62 }
  0xa9   :  { %v328_v17 = vadd.f32 %v296_v51, %v136_v31  ;;  %v330_v27 = vadd.f32 %v298_v0, %v138_v14  ;;  %v327_v26 = vadd.f32 %v295_v43, %v135_v59  ;;  %v329_v19 = vadd.f32 %v297_v18, %v137_v52  ;;  %v3684_v0 = vld [vmem:[#allocation7_spill] sm:$0xff] }
  0xaa   :  { %v2957_v56 = vpop.xlane.xlu0 %207  ;;  %v300_v4 = vmul.f32 %v2568_v37, %v2929_v54  ;;  %v302_v28 = vmul.f32 %v3683_v23, %v2929_v54 }
  0xab   :  { %v2967_v32 = vpop.xlane.xlu1 %367  ;;  %v488_v51 = vadd.f32 %v456_v60, %v328_v17  ;;  %v490_v14 = vadd.f32 %v458_v55, %v330_v27  ;;  %v487_v43 = vadd.f32 %v455_v49, %v327_v26  ;;  %v489_v18 = vadd.f32 %v457_v40, %v329_v19  ;;  %v3686_v17 = vld [vmem:[#allocation9_spill] sm:$0xff] }
  0xac   :  { %v312_v52 = vmul.f32 %v2475_v7, %v2957_v56  ;;  %v472_v10 = vmul.f32 %v2479_v8, %v2967_v32  ;;  %v314_v20 = vmul.f32 %v2483_v9, %v2957_v56  ;;  %v474_v59 = vmul.f32 %v2491_v11, %v2967_v32  ;;  %v3687_v26 = vld [vmem:[#allocation13_spill] sm:$0xff] }
  0xad   :  { %v604_v31 = vadd.f32 %v3684_v0, %v488_v51  ;;  %v606_v15 = vadd.f32 %v3685_v44, %v490_v14  ;;  %v603_v27 = vadd.f32 %v3686_v17, %v487_v43  ;;  %v605_v19 = vadd.f32 %v3687_v26, %v489_v18  ;;  %v2991_v18 = vld [vmem:[#allocation2 + $0x580] sm:$0xff] }
  0xae   :  { %v344_v49 = vadd.f32 %v312_v52, %v152_v29  ;;  %v346_v55 = vadd.f32 %v314_v20, %v154_v63  ;;  %v311_v7 = vmul.f32 %v2495_v12, %v2957_v56  ;;  %v471_v8 = vmul.f32 %v2499_v13, %v2967_v32  ;;  %v3688_v52 = vld [vmem:[#allocation6_spill] sm:$0xff]  ;;  %v3691_v20 = vld [vmem:[#allocation11_spill] sm:$0xff] }
  0xaf   :  { %v636_v9 = vmax.f32 %v604_v31, 0.0  ;;  %v638_v60 = vmax.f32 %v606_v15, 0.0  ;;  %v635_v40 = vmax.f32 %v603_v27, 0.0  ;;  %v637_v11 = vmax.f32 %v605_v19, 0.0  ;;  %v3695_v31 = vld [vmem:[#allocation12_spill] sm:$0xff] }
  0xb0   :  { %v504_v23 = vadd.f32 %v472_v10, %v344_v49  ;;  %v506_v51 = vadd.f32 %v474_v59, %v346_v55  ;;  %v343_v39 = vadd.f32 %v311_v7, %v151_v42  ;;  %v313_v14 = vmul.f32 %v2531_v24, %v2957_v56  ;;  %v2993_v42 = vld [vmem:[#allocation2 + $0x588] sm:$0xff]  ;;  %v3689_v24 = vld [vmem:[#allocation5_spill] sm:$0xff]  ;;  %v3697_v19 = vld [vmem:[#allocation16_spill] sm:$0xff] }
  0xb1   :  { %994 = vmatprep.mubr.f32.mxu0 %v636_v9  ;;  %1069 = vmatprep.mubr.f32.mxu1 %v638_v60  ;;  %v473_v29 = vmul.f32 %v2535_v25, %v2967_v32  ;;  %v332_v63 = vadd.f32 %v300_v4, %v140_v1  ;;  %v334_v12 = vadd.f32 %v302_v28, %v142_v58  ;;  %v3692_v59 = vld [vmem:[#allocation10_spill] sm:$0xff]  ;;  %v3001_v4 = vld [vmem:[#allocation2 + $0x400] sm:$0xff]  ;;  %v3698_v49 = vld [vmem:[#allocation15_spill] sm:$0xff] }
  0xb2   :  { %995 = vmatmul.mubr.f32.vlgmr.msra.gmra.mrb[0].mxu0 %v635_v40  ;;  %1070 = vmatmul.mubr.f32.vlgmr.msra.gmra.mrb[0].mxu1 %v637_v11  ;;  %v620_v13 = vadd.f32 %v3684_v0, %v504_v23  ;;  %v622_v15 = vadd.f32 %v3685_v44, %v506_v51  ;;  %v503_v43 = vadd.f32 %v471_v8, %v343_v39  ;;  %v3003_v23 = vld [vmem:[#allocation2 + $0x408] sm:$0xff]  ;;  %v3701_v8 = vld [vmem:[#allocation33_spill] sm:$0xff]  ;;  %v3702_v60 = vld [vmem:[#allocation32_spill] sm:$0xff] }
  0xb3   :  { %v3690_v10 = vpack.c.bf16 %v3688_v52, %v3689_v24  ;;  %v3693_v25 = vpack.c.bf16 %v3691_v20, %v3692_v59  ;;  %v345_v28 = vadd.f32 %v313_v14, %v153_v2  ;;  %v492_v58 = vadd.f32 %v460_v57, %v332_v63  ;;  %v3694_v0 = vld [vmem:[#allocation14_spill] sm:$0xff]  ;;  %v3700_v2 = vld [vmem:[#allocation29_spill] sm:$0xff] }
  0xb4   :  { %v494_v1 = vadd.f32 %v462_v21, %v334_v12  ;;  %v652_v39 = vmax.f32 %v620_v13, 0.0  ;;  %v654_v44 = vmax.f32 %v622_v15, 0.0  ;;  %v3696_v27 = vpack.c.bf16 %v3694_v0, %v3695_v31  ;;  %v3703_v14 = vld [vmem:[#allocation34_spill] sm:$0xff]  ;;  %v3704_v12 = vld [vmem:[#allocation23_spill] sm:$0xff]  ;;  %v3056_v31 = vld [vmem:[#allocation2 + $0x418] sm:$0xff] }
  0xb5   :  { %2084 = vmatpush3.bf16.msra.mxu0 %v3690_v10  ;;  %2116 = vmatpush3.bf16.msra.mxu1 %v3693_v25  ;;  %v3699_v55 = vpack.c.bf16 %v3697_v19, %v3698_v49  ;;  %v619_v7 = vadd.f32 %v3686_v17, %v503_v43  ;;  %v299_v57 = vmul.f32 %v3700_v2, %v2929_v54  ;;  %v3026_v15 = vld [vmem:[#allocation2 + $0x508] sm:$0xff]  ;;  %v3708_v25 = vld [vmem:[#allocation31_spill] sm:$0xff]  ;;  %v3712_v49 = vld [vmem:[#allocation41_spill] sm:$0xff] }
  0xb6   :  { %2086 = vmatprep.subr.bf16.mxu0 %v3696_v27  ;;  %v505_v21 = vadd.f32 %v473_v29, %v345_v28  ;;  %v608_v9 = vadd.f32 %v3701_v8, %v492_v58  ;;  %v301_v40 = vmul.f32 %v3702_v60, %v2929_v54  ;;  %999 = vmatprep.mubr.f32.mxu0 %v652_v39  ;;  %v3024_v29 = vld [vmem:[#allocation2 + $0x500] sm:$0xff]  ;;  %v3707_v20 = vld [vmem:[#allocation30_spill] sm:$0xff]  ;;  %v3039_v58 = vld [vmem:[#allocation2 + $0x490] sm:$0xff] }
  0xb7   :  { %2118 = vmatprep.subr.bf16.mxu1 %v3699_v55  ;;  %1074 = vmatprep.mubr.f32.mxu1 %v654_v44  ;;  %v651_v51 = vmax.f32 %v619_v7, 0.0  ;;  %v610_v63 = vadd.f32 %v3703_v14, %v494_v1  ;;  %v139_v17 = vmul.f32 %v3704_v12, %v2877_v22  ;;  %v3705_v52 = vpack.c.bf16 %v2560_v34, %v2558_v33  ;;  %v3041_v1 = vld [vmem:[#allocation2 + $0x498] sm:$0xff]  ;;  %v3709_v33 = vld [vmem:[#allocation18_spill] sm:$0xff]  ;;  %v3054_v0 = vld [vmem:[#allocation2 + $0x410] sm:$0xff] }
  0xb8   :  { %v621_v43 = vadd.f32 %v3687_v26, %v505_v21  ;;  %v3706_v24 = vpack.c.bf16 %v2564_v36, %v2562_v35  ;;  %v640_v10 = vmax.f32 %v608_v9, 0.0  ;;  %v459_v59 = vmul.f32 %v3707_v20, %v2893_v61  ;;  %v3043_v26 = vld [vmem:[#allocation2 + $0x590] sm:$0xff]  ;;  %v3052_v44 = vld [vmem:[#allocation2 + $0x598] sm:$0xff]  ;;  %v3071_v9 = vld [vmem:[#allocation2 + $0x4a0] sm:$0xff] }
  0xb9   :  { %2088 = vmatpush3.bf16.msra.mxu0 %v3705_v52  ;;  %v141_v28 = vmul.f32 %v3708_v25, %v2877_v22  ;;  %v3710_v34 = vpack.c.bf16 %v2580_v41, %v3709_v33  ;;  %v331_v35 = vadd.f32 %v299_v57, %v139_v17  ;;  %v156_v36 = vmul.f32 %v2549_v30, %v2939_v62  ;;  %v3069_v21 = vld [vmem:[#allocation2 + $0x518] sm:$0xff]  ;;  %v3092_v52 = vld [vmem:[#allocation2 + $0x5a8] sm:$0xff]  ;;  %v3728_v17 = vld [vmem:[#allocation25_spill] sm:$0xff] }
  0xba   :  { %2120 = vmatpush3.bf16.msra.mxu1 %v3706_v24  ;;  %1000 = vmatmul.mubr.f32.gmra.mrb[2].mxu0 %v651_v51  ;;  %v316_v39 = vmul.f32 %v2568_v37, %v2957_v56  ;;  %v653_v27 = vmax.f32 %v621_v43, 0.0  ;;  %v3711_v19 = vpack.c.bf16 %v2594_v46, %v2592_v45  ;;  %v461_v55 = vmul.f32 %v3712_v49, %v2893_v61  ;;  %v3065_v37 = vld [vmem:[#allocation2 + $0x510] sm:$0xff]  ;;  %v3073_v51 = vld [vmem:[#allocation2 + $0x4a8] sm:$0xff]  ;;  %v3090_v43 = vld [vmem:[#allocation2 + $0x5a0] sm:$0xff] }
  0xbb   :  { %2090 = vmatprep.subr.bf16.mxu0 %v3710_v34  ;;  %1144 = vmatprep.mubr.f32.mxu0 %v640_v10  ;;  %v333_v41 = vadd.f32 %v301_v40, %v141_v28  ;;  %v642_v7 = vmax.f32 %v610_v63, 0.0  ;;  %3713 = vst [vmem:[#allocation7_spill] sm:$0xff] %v3071_v9  ;;  %3714 = vst [vmem:[#allocation8_spill] sm:$0xff] %v3073_v51  ;;  %v3077_v45 = vrot.slane %v2737_v3, %v2469_v5  ;;  %v3094_v5 = vld [vmem:[#allocation2 + $0x420] sm:$0xff]  ;;  %v3719_v24 = vld [vmem:[#allocation22_spill] sm:$0xff] }
  0xbc   :  { %2122 = vmatprep.subr.bf16.mxu1 %v3711_v19  ;;  %v3081_v46 = vrot.slane %v2732_v50, %v2505_v16  ;;  %1075 = vmatmul.mubr.f32.gmra.mrb[2].mxu1 %v653_v27  ;;  %v3715_v40 = vpack.c.bf16 %v2598_v48, %v2596_v47  ;;  %3716 = vst [vmem:[#allocation9_spill] sm:$0xff] %v3090_v43  ;;  %3717 = vst [vmem:[#allocation13_spill] sm:$0xff] %v3092_v52  ;;  %v3720_v47 = vld [vmem:[#allocation21_spill] sm:$0xff]  ;;  %v3105_v34 = vld [vmem:[#allocation2 + $0x428] sm:$0xff] }
  0xbd   :  { %3718 = vst [vmem:[#allocation6_spill] sm:$0xff] %v3094_v5  ;;  %v3098_v50 = vrot.slane %v2737_v3, %v2471_v6  ;;  %1219 = vmatprep.mubr.f32.mxu1 %v642_v7  ;;  %v3721_v48 = vpack.c.bf16 %v3719_v24, %v3720_v47  ;;  %v491_v10 = vadd.f32 %v459_v59, %v331_v35  ;;  %3722 = vst [vmem:[#allocation5_spill] sm:$0xff] %v3105_v34  ;;  %v3107_v27 = vld [vmem:[#allocation2 + $0x520] sm:$0xff]  ;;  %v3109_v19 = vld [vmem:[#allocation2 + $0x528] sm:$0xff] }
  0xbe   :  { %2092 = vmatpush3.bf16.msra.mxu0 %v3715_v40  ;;  %v348_v28 = vadd.f32 %v316_v39, %v156_v36  ;;  %v476_v33 = vmul.f32 %v2572_v38, %v2967_v32  ;;  %3723 = vst [vmem:[#allocation11_spill] sm:$0xff] %v3107_v27  ;;  %3724 = vst [vmem:[#allocation10_spill] sm:$0xff] %v3109_v19  ;;  %v3725_v40 = vld [vmem:[#allocation24_spill] sm:$0xff]  ;;  %v3727_v7 = vld [vmem:[#allocation26_spill] sm:$0xff]  ;;  %v493_v24 = vadd.f32 %v461_v55, %v333_v41 }
  0xbf   :  { %2124 = vmatpush3.bf16.msra.mxu1 %v3721_v48  ;;  %v3726_v6 = vpack.c.bf16 %v2610_v53, %v3725_v40  ;;  %v3729_v63 = vpack.c.bf16 %v3727_v7, %v3728_v17  ;;  %v3730_v59 = vld [vmem:[#allocation17_spill] sm:$0xff]  ;;  %v3731_v38 = vld [vmem:[#allocation19_spill] sm:$0xff]  ;;  %v3123_v47 = vld [vmem:[#allocation2 + $0x4b8] sm:$0xff]  ;;  %v3133_v41 = vrot.slane %v2737_v3, %v2505_v16  ;;  %v315_v7 = vmul.f32 %v3700_v2, %v2957_v56 }
  0xc0   :  { %v158_v35 = vmul.f32 %v3730_v59, %v2939_v62  ;;  %v318_v36 = vmul.f32 %v3731_v38, %v2957_v56  ;;  %v3121_v39 = vld [vmem:[#allocation2 + $0x4b0] sm:$0xff]  ;;  %3733 = vst [vmem:[#allocation12_spill] sm:$0xff] %v3123_v47  ;;  %v3734_v55 = vld [vmem:[#allocation28_spill] sm:$0xff]  ;;  %v3740_v3 = vld [vmem:[#allocation38_spill] sm:$0xff] }
  0xc1   :  { %2094 = vmatprep.subr.bf16.mxu0 %v3726_v6  ;;  %2126 = vmatprep.subr.bf16.mxu1 %v3729_v63  ;;  %3732 = vst [vmem:[#allocation14_spill] sm:$0xff] %v3121_v39  ;;  %v3735_v17 = vld [vmem:[#allocation27_spill] sm:$0xff]  ;;  %v155_v6 = vmul.f32 %v3704_v12, %v2939_v62  ;;  %v3737_v63 = vld [vmem:[#allocation36_spill] sm:$0xff]  ;;  %v3741_v48 = vld [vmem:[#allocation37_spill] sm:$0xff]  ;;  %v508_v12 = vadd.f32 %v476_v33, %v348_v28 }
  0xc2   :  { %v3736_v40 = vpack.c.bf16 %v3734_v55, %v3735_v17  ;;  %v3738_v53 = vld [vmem:[#allocation35_spill] sm:$0xff]  ;;  %v3742_v55 = vpack.c.bf16 %v3740_v3, %v3741_v48  ;;  %v3744_v57 = vld [vmem:[#allocation40_spill] sm:$0xff]  ;;  %v157_v28 = vmul.f32 %v3708_v25, %v2939_v62  ;;  %v3755_v2 = vld [vmem:[#allocation58_spill] sm:$0xff] }
  0xc3   :  { %v3739_v16 = vpack.c.bf16 %v3737_v63, %v3738_v53  ;;  %v3743_v17 = vld [vmem:[#allocation47_spill] sm:$0xff]  ;;  %v3747_v38 = vld [vmem:[#allocation48_spill] sm:$0xff]  ;;  %v350_v53 = vadd.f32 %v318_v36, %v158_v35  ;;  %v3752_v35 = vld [vmem:[#allocation42_spill] sm:$0xff] }
  0xc4   :  { %2096 = vmatpush3.bf16.msra.mxu0 %v3736_v40  ;;  %v3153_v40 = vadd.f32 %v3743_v17, %v491_v10  ;;  %v3745_v59 = vld [vmem:[#allocation39_spill] sm:$0xff]  ;;  %v3161_v13 = vadd.f32 %v3747_v38, %v493_v24  ;;  %v3748_v63 = vld [vmem:[#allocation20_spill] sm:$0xff]  ;;  %v475_v10 = vmul.f32 %v3707_v20, %v2967_v32  ;;  %v145_v20 = vmul.f32 %v3755_v2, %v2877_v22  ;;  %v3756_v11 = vld [vmem:[#allocation86_spill] sm:$0xff] }
  0xc5   :  { %2128 = vmatpush3.bf16.msra.mxu1 %v3739_v16  ;;  %2098 = vmatprep.subr.bf16.mxu0 %v3742_v55  ;;  %v3746_v30 = vpack.c.bf16 %v3744_v57, %v3745_v59  ;;  %v478_v16 = vmul.f32 %v3748_v63, %v2967_v32  ;;  %v3749_v48 = vld [vmem:[#allocation56_spill] sm:$0xff]  ;;  %v317_v57 = vmul.f32 %v3702_v60, %v2957_v56  ;;  %v3751_v24 = vld [vmem:[#allocation43_spill] sm:$0xff]  ;;  %v3754_v55 = vld [vmem:[#allocation82_spill] sm:$0xff] }
  0xc6   :  { %v143_v3 = vmul.f32 %v3749_v48, %v2877_v22  ;;  %v3753_v36 = vpack.c.bf16 %v3751_v24, %v3752_v35  ;;  %v347_v59 = vadd.f32 %v315_v7, %v155_v6  ;;  %v463_v63 = vmul.f32 %v3754_v55, %v2893_v61  ;;  %v3757_v39 = vld [vmem:[#allocation45_spill] sm:$0xff]  ;;  %v3758_v47 = vld [vmem:[#allocation44_spill] sm:$0xff]  ;;  %v3760_v27 = vld [vmem:[#allocation50_spill] sm:$0xff] }
  0xc7   :  { %2130 = vmatprep.subr.bf16.mxu1 %v3746_v30  ;;  %v3750_v30 = vld [vmem:[#allocation81_spill] sm:$0xff]  ;;  %v305_v25 = vmul.f32 %v3756_v11, %v2929_v54  ;;  %v3759_v60 = vpack.c.bf16 %v3757_v39, %v3758_v47  ;;  %v3761_v19 = vld [vmem:[#allocation46_spill] sm:$0xff]  ;;  %v3191_v24 = vadd.f32 %v3701_v8, %v508_v12  ;;  %v3765_v34 = vld [vmem:[#allocation51_spill] sm:$0xff]  ;;  %v510_v52 = vadd.f32 %v478_v16, %v350_v53 }
  0xc8   :  { %v303_v33 = vmul.f32 %v3750_v30, %v2929_v54  ;;  %2100 = vmatpush3.bf16.msra.mxu0 %v3753_v36  ;;  %v3762_v5 = vpack.c.bf16 %v3760_v27, %v3761_v19  ;;  %v3763_v6 = vld [vmem:[#allocation69_spill] sm:$0xff]  ;;  %v3764_v36 = vld [vmem:[#allocation52_spill] sm:$0xff]  ;;  %v3767_v9 = vld [vmem:[#allocation75_spill] sm:$0xff]  ;;  %v477_v8 = vmul.f32 %v3712_v49, %v2967_v32 }
  0xc9   :  { %2132 = vmatpush3.bf16.msra.mxu1 %v3759_v60  ;;  %v304_v7 = vmul.f32 %v3763_v6, %v2929_v54  ;;  %v3766_v43 = vpack.c.bf16 %v3764_v36, %v3765_v34  ;;  %v306_v39 = vmul.f32 %v3767_v9, %v2929_v54  ;;  %v337_v47 = vadd.f32 %v305_v25, %v145_v20  ;;  %v3768_v60 = vld [vmem:[#allocation87_spill] sm:$0xff]  ;;  %v3769_v19 = vld [vmem:[#allocation49_spill] sm:$0xff]  ;;  %v3771_v6 = vld [vmem:[#allocation54_spill] sm:$0xff] }
  0xca   :  { %2102 = vmatprep.subr.bf16.mxu0 %v3762_v5  ;;  %v335_v35 = vadd.f32 %v303_v33, %v143_v3  ;;  %v465_v27 = vmul.f32 %v3768_v60, %v2893_v61  ;;  %v349_v5 = vadd.f32 %v317_v57, %v157_v28  ;;  %v144_v12 = vmul.f32 %v3769_v19, %v2877_v22  ;;  %v3770_v33 = vld [vmem:[#allocation55_spill] sm:$0xff]  ;;  %v3773_v53 = vld [vmem:[#allocation70_spill] sm:$0xff]  ;;  %v3774_v20 = vld [vmem:[#allocation53_spill] sm:$0xff] }
  0xcb   :  { %2134 = vmatprep.subr.bf16.mxu1 %v3766_v43  ;;  %v3772_v34 = vpack.c.bf16 %v3770_v33, %v3771_v6  ;;  %v507_v43 = vadd.f32 %v475_v10, %v347_v59  ;;  %v464_v16 = vmul.f32 %v3773_v53, %v2893_v61  ;;  %v146_v25 = vmul.f32 %v3774_v20, %v2877_v22  ;;  %v3775_v28 = vld [vmem:[#allocation59_spill] sm:$0xff]  ;;  %v3776_v57 = vld [vmem:[#allocation57_spill] sm:$0xff]  ;;  %v3779_v51 = vld [vmem:[#allocation60_spill] sm:$0xff] }
  0xcc   :  { %v495_v3 = vadd.f32 %v463_v63, %v335_v35  ;;  %v497_v36 = vadd.f32 %v465_v27, %v337_v47  ;;  %v3777_v9 = vpack.c.bf16 %v3775_v28, %v3776_v57  ;;  %v3778_v49 = vld [vmem:[#allocation61_spill] sm:$0xff]  ;;  %v639_v63 = vmax.f32 %v3153_v40, 0.0  ;;  %v3781_v35 = vld [vmem:[#allocation83_spill] sm:$0xff]  ;;  %v3783_v33 = vld [vmem:[#allocation64_spill] sm:$0xff] }
  0xcd   :  { %2104 = vmatpush3.bf16.msra.mxu0 %v3772_v34  ;;  %v3780_v19 = vpack.c.bf16 %v3778_v49, %v3779_v51  ;;  %v336_v6 = vadd.f32 %v304_v7, %v144_v12  ;;  %v159_v59 = vmul.f32 %v3749_v48, %v2939_v62  ;;  %v3784_v34 = vld [vmem:[#allocation63_spill] sm:$0xff]  ;;  %v338_v27 = vadd.f32 %v306_v39, %v146_v25  ;;  %v3787_v57 = vld [vmem:[#allocation90_spill] sm:$0xff] }
  0xce   :  { %2136 = vmatpush3.bf16.msra.mxu1 %v3777_v9  ;;  %v3221_v10 = vadd.f32 %v3781_v35, %v495_v3  ;;  %v3785_v47 = vpack.c.bf16 %v3783_v33, %v3784_v34  ;;  %v3786_v9 = vld [vmem:[#allocation76_spill] sm:$0xff]  ;;  %v3231_v51 = vadd.f32 %v3787_v57, %v497_v36  ;;  %v319_v40 = vmul.f32 %v3750_v30, %v2957_v56  ;;  %v3789_v12 = vld [vmem:[#allocation66_spill] sm:$0xff]  ;;  %v3790_v3 = vld [vmem:[#allocation65_spill] sm:$0xff] }
  0xcf   :  { %2106 = vmatprep.subr.bf16.mxu0 %v3780_v19  ;;  %v466_v28 = vmul.f32 %v3786_v9, %v2893_v61  ;;  %v641_v7 = vmax.f32 %v3161_v13, 0.0  ;;  %v479_v19 = vmul.f32 %v3754_v55, %v2967_v32  ;;  %v161_v48 = vmul.f32 %v3755_v2, %v2939_v62  ;;  %v3792_v13 = vld [vmem:[#allocation68_spill] sm:$0xff]  ;;  %v3793_v34 = vld [vmem:[#allocation67_spill] sm:$0xff]  ;;  %v3795_v55 = vld [vmem:[#allocation73_spill] sm:$0xff] }
  0xd0   :  { %3782 = vst [vmem:[#allocation16_spill] sm:$0xff] %v3221_v10  ;;  %2138 = vmatprep.subr.bf16.mxu1 %v3785_v47  ;;  %3788 = vst [vmem:[#allocation15_spill] sm:$0xff] %v3231_v51  ;;  %v321_v39 = vmul.f32 %v3756_v11, %v2957_v56  ;;  %v3791_v25 = vpack.c.bf16 %v3789_v12, %v3790_v3  ;;  %v626_v36 = vadd.f32 %v3703_v14, %v510_v52  ;;  %v3796_v51 = vld [vmem:[#allocation72_spill] sm:$0xff]  ;;  %v3798_v14 = vld [vmem:[#allocation62_spill] sm:$0xff] }
  0xd1   :  { %v623_v49 = vadd.f32 %v3743_v17, %v507_v43  ;;  %v509_v30 = vadd.f32 %v477_v8, %v349_v5  ;;  %v351_v33 = vadd.f32 %v319_v40, %v159_v59  ;;  %v3794_v47 = vpack.c.bf16 %v3792_v13, %v3793_v34  ;;  %v3799_v17 = vld [vmem:[#allocation78_spill] sm:$0xff]  ;;  %v3802_v3 = vld [vmem:[#allocation93_spill] sm:$0xff]  ;;  %v3805_v13 = vld [vmem:[#allocation95_spill] sm:$0xff] }
  0xd2   :  { %2108 = vmatpush3.bf16.msra.mxu0 %v3791_v25  ;;  %v3797_v2 = vpack.c.bf16 %v3795_v55, %v3796_v51  ;;  %v656_v11 = vmax.f32 %v3191_v24, 0.0  ;;  %v353_v10 = vadd.f32 %v321_v39, %v161_v48  ;;  %v481_v12 = vmul.f32 %v3768_v60, %v2967_v32  ;;  %v3800_v5 = vld [vmem:[#allocation74_spill] sm:$0xff]  ;;  %v3804_v39 = vld [vmem:[#allocation91_spill] sm:$0xff] }
  0xd3   :  { %2140 = vmatpush3.bf16.msra.mxu1 %v3794_v47  ;;  %v148_v52 = vmul.f32 %v3798_v14, %v2877_v22  ;;  %v3801_v8 = vpack.c.bf16 %v3799_v17, %v3800_v5  ;;  %v496_v43 = vadd.f32 %v464_v16, %v336_v6  ;;  %v498_v59 = vadd.f32 %v466_v28, %v338_v27  ;;  %v3803_v24 = vld [vmem:[#allocation94_spill] sm:$0xff]  ;;  %v3806_v47 = vld [vmem:[#allocation80_spill] sm:$0xff]  ;;  %v3807_v55 = vld [vmem:[#allocation79_spill] sm:$0xff] }
  0xd4   :  { %2110 = vmatprep.subr.bf16.mxu0 %v3797_v2  ;;  %v511_v40 = vadd.f32 %v479_v19, %v351_v33  ;;  %v308_v51 = vmul.f32 %v3802_v3, %v2929_v54  ;;  %v513_v25 = vadd.f32 %v481_v12, %v353_v10  ;;  %v468_v48 = vmul.f32 %v3803_v24, %v2893_v61  ;;  %v3809_v10 = vld [vmem:[#allocation98_spill] sm:$0xff]  ;;  %v3810_v19 = vld [vmem:[#allocation85_spill] sm:$0xff]  ;;  %v3811_v33 = vld [vmem:[#allocation84_spill] sm:$0xff] }
  0xd5   :  { %2142 = vmatprep.subr.bf16.mxu1 %v3801_v8  ;;  %v150_v60 = vmul.f32 %v3804_v39, %v2877_v22  ;;  %v310_v34 = vmul.f32 %v3805_v13, %v2929_v54  ;;  %v3808_v2 = vpack.c.bf16 %v3806_v47, %v3807_v55  ;;  %v625_v16 = vadd.f32 %v3747_v38, %v509_v30  ;;  %v3813_v17 = vld [vmem:[#allocation89_spill] sm:$0xff]  ;;  %v3814_v5 = vld [vmem:[#allocation88_spill] sm:$0xff] }
  0xd6   :  { %v3274_v6 = vadd.f32 %v3781_v35, %v511_v40  ;;  %v340_v27 = vadd.f32 %v308_v51, %v148_v52  ;;  %v470_v28 = vmul.f32 %v3809_v10, %v2893_v61  ;;  %v3812_v12 = vpack.c.bf16 %v3810_v19, %v3811_v33  ;;  %v3816_v35 = vld [vmem:[#allocation92_spill] sm:$0xff]  ;;  %v3818_v40 = vld [vmem:[#allocation71_spill] sm:$0xff] }
  0xd7   :  { %2112 = vmatpush3.bf16.msra.mxu0 %v3808_v2  ;;  %v3815_v8 = vpack.c.bf16 %v3813_v17, %v3814_v5  ;;  %v658_v9 = vmax.f32 %v626_v36, 0.0  ;;  %v3285_v47 = vadd.f32 %v3787_v57, %v513_v25  ;;  %v342_v38 = vadd.f32 %v310_v34, %v150_v60  ;;  %v3819_v2 = vld [vmem:[#allocation99_spill] sm:$0xff]  ;;  %v3820_v33 = vld [vmem:[#allocation100_spill] sm:$0xff]  ;;  %v3821_v57 = vld [vmem:[#allocation77_spill] sm:$0xff] }
  0xd8   :  { %2144 = vmatpush3.bf16.msra.mxu1 %v3812_v12  ;;  %v147_v30 = vmul.f32 %v3816_v35, %v2877_v22  ;;  %v3817_v52 = vpack.c.bf16 %v2993_v42, %v2991_v18  ;;  %v612_v51 = vadd.f32 %v3818_v40, %v496_v43  ;;  %v500_v55 = vadd.f32 %v468_v48, %v340_v27  ;;  %v3822_v34 = vld [vmem:[#allocation96_spill] sm:$0xff]  ;;  %v3823_v17 = vld [vmem:[#allocation101_spill] sm:$0xff] }
  0xd9   :  { %2146 = vmatprep.subr.bf16.mxu0 %v3815_v8  ;;  %v307_v19 = vmul.f32 %v3819_v2, %v2929_v54  ;;  %v467_v36 = vmul.f32 %v3820_v33, %v2893_v61  ;;  %v614_v25 = vadd.f32 %v3821_v57, %v498_v59  ;;  %v502_v60 = vadd.f32 %v470_v28, %v342_v38  ;;  %v3824_v43 = vld [vmem:[#allocation97_spill] sm:$0xff] }
  0xda   :  { %2178 = vmatprep.subr.bf16.mxu1 %v3817_v52  ;;  %1145 = vmatmul.mubr.f32.vlgmr.msra.gmra.mrb[4].mxu0 %v639_v63  ;;  %v149_v12 = vmul.f32 %v3822_v34, %v2877_v22  ;;  %v309_v18 = vmul.f32 %v3823_v17, %v2929_v54  ;;  %v655_v42 = vmax.f32 %v623_v49, 0.0  ;;  %v3303_v48 = vadd.f32 %v3824_v43, %v500_v55  ;;  %v3832_v52 = vld [vmem:[#allocation7_spill] sm:$0xff]  ;;  %v802_v55 = vld [vmem:[#allocation2 + $0x438] sm:$0xff] }
  0xdb   :  { %1220 = vmatmul.mubr.f32.vlgmr.msra.gmra.mrb[4].mxu1 %v641_v7  ;;  %1149 = vmatprep.mubr.f32.mxu0 %v656_v11  ;;  %v339_v27 = vadd.f32 %v307_v19, %v147_v30  ;;  %v469_v5 = vmul.f32 %v3081_v46, %v2893_v61  ;;  %v3825_v63 = vpack.c.bf16 %v3003_v23, %v3001_v4  ;;  %v657_v59 = vmax.f32 %v625_v16, 0.0  ;;  %v3831_v30 = vld [vmem:[#allocation8_spill] sm:$0xff] }
  0xdc   :  { %1224 = vmatprep.mubr.f32.mxu1 %v658_v9  ;;  %v3311_v22 = vadd.f32 %v3077_v45, %v502_v60  ;;  %v341_v54 = vadd.f32 %v309_v18, %v149_v12  ;;  %v164_v7 = vmul.f32 %v3798_v14, %v2939_v62  ;;  %v3826_v49 = vpack.c.bf16 %v3026_v15, %v3024_v29  ;;  %v819_v12 = vld [vmem:[#allocation2 + $0x4c0] sm:$0xff]  ;;  %v820_v18 = vld [vmem:[#allocation2 + $0x4c8] sm:$0xff] }
  0xdd   :  { %2148 = vmatpush3.bf16.msra.mxu0 %v3825_v63  ;;  %v3827_v61 = vpack.c.bf16 %v3041_v1, %v3039_v58  ;;  %v644_v9 = vmax.f32 %v612_v51, 0.0  ;;  %v499_v11 = vadd.f32 %v467_v36, %v339_v27  ;;  %v324_v4 = vmul.f32 %v3802_v3, %v2957_v56  ;;  %v849_v1 = vld [vmem:[#allocation2 + $0x5b0] sm:$0xff]  ;;  %v850_v3 = vld [vmem:[#allocation2 + $0x5b8] sm:$0xff]  ;;  %v851_v63 = vld [vmem:[#allocation2 + $0x5c0] sm:$0xff] }
  0xde   :  { %2180 = vmatpush3.bf16.msra.mxu1 %v3826_v49  ;;  %v484_v23 = vmul.f32 %v3803_v24, %v2967_v32  ;;  %1150 = vmatmul.mubr.f32.gmra.mrb[6].mxu0 %v655_v42  ;;  %v3828_v14 = vpack.c.bf16 %v3052_v44, %v3043_v26  ;;  %v646_v16 = vmax.f32 %v614_v25, 0.0  ;;  %v501_v29 = vadd.f32 %v469_v5, %v341_v54  ;;  %v3834_v25 = vld [vmem:[#allocation13_spill] sm:$0xff]  ;;  %v3838_v49 = vld [vmem:[#allocation6_spill] sm:$0xff] }
  0xdf   :  { %2150 = vmatprep.subr.bf16.mxu0 %v3827_v61  ;;  %v166_v15 = vmul.f32 %v3804_v39, %v2939_v62  ;;  %v326_v58 = vmul.f32 %v3805_v13, %v2957_v56  ;;  %1225 = vmatmul.mubr.f32.gmra.mrb[6].mxu1 %v657_v59  ;;  %v3333_v28 = vadd.f32 %v3098_v50, %v499_v11 }
  0xe0   :  { %2182 = vmatprep.subr.bf16.mxu1 %v3828_v14  ;;  %1294 = vmatprep.mubr.f32.mxu0 %v644_v9  ;;  %v356_v24 = vadd.f32 %v324_v4, %v164_v7  ;;  %v486_v26 = vmul.f32 %v3809_v10, %v2967_v32  ;;  %v3829_v44 = vpack.c.bf16 %v3056_v31, %v3054_v0  ;;  %v801_v10 = vld [vmem:[#allocation2 + $0x430] sm:$0xff]  ;;  %v3837_v7 = vld [vmem:[#allocation5_spill] sm:$0xff]  ;;  %v3840_v4 = vld [vmem:[#allocation10_spill] sm:$0xff] }
  0xe1   :  { %1369 = vmatprep.mubr.f32.mxu1 %v646_v16  ;;  %v3341_v39 = vadd.f32 %v3133_v41, %v501_v29  ;;  %v358_v13 = vadd.f32 %v326_v58, %v166_v15  ;;  %v163_v8 = vmul.f32 %v3816_v35, %v2939_v62  ;;  %v3830_v38 = vpack.c.bf16 %v3069_v21, %v3065_v37  ;;  %v833_v0 = vld [vmem:[#allocation2 + $0x530] sm:$0xff]  ;;  %v3835_v35 = vld [vmem:[#allocation9_spill] sm:$0xff]  ;;  %v834_v21 = vld [vmem:[#allocation2 + $0x538] sm:$0xff] }
  0xe2   :  { %2152 = vmatpush3.bf16.msra.mxu0 %v3829_v44  ;;  %v3833_v51 = vpack.c.bf16 %v3831_v30, %v3832_v52  ;;  %v516_v31 = vadd.f32 %v484_v23, %v356_v24  ;;  %v323_v19 = vmul.f32 %v3819_v2, %v2957_v56  ;;  %v483_v36 = vmul.f32 %v3820_v33, %v2967_v32  ;;  %v852_v2 = vld [vmem:[#allocation2 + $0x5c8] sm:$0xff]  ;;  %v3843_v14 = vld [vmem:[#allocation12_spill] sm:$0xff] }
  0xe3   :  { %2184 = vmatpush3.bf16.msra.mxu1 %v3830_v38  ;;  %v3836_v60 = vpack.c.bf16 %v3834_v25, %v3835_v35  ;;  %v2189_v37 = vpack.c.bf16 %v850_v3, %v849_v1  ;;  %v518_v42 = vadd.f32 %v486_v26, %v358_v13  ;;  %v165_v27 = vmul.f32 %v3822_v34, %v2939_v62  ;;  %v804_v58 = vld [vmem:[#allocation2 + $0x448] sm:$0xff]  ;;  %v835_v1 = vld [vmem:[#allocation2 + $0x540] sm:$0xff]  ;;  %v822_v44 = vld [vmem:[#allocation2 + $0x4d8] sm:$0xff] }
  0xe4   :  { %2154 = vmatprep.subr.bf16.mxu0 %v3833_v51  ;;  %v325_v5 = vmul.f32 %v3823_v17, %v2957_v56  ;;  %v3363_v59 = vadd.f32 %v3824_v43, %v516_v31  ;;  %v355_v33 = vadd.f32 %v323_v19, %v163_v8  ;;  %v485_v54 = vmul.f32 %v3081_v46, %v2967_v32  ;;  %v3841_v17 = vld [vmem:[#allocation11_spill] sm:$0xff]  ;;  %v3844_v43 = vld [vmem:[#allocation14_spill] sm:$0xff]  ;;  %v803_v46 = vld [vmem:[#allocation2 + $0x440] sm:$0xff] }
  0xe5   :  { %2186 = vmatprep.subr.bf16.mxu1 %v3836_v60  ;;  %v3839_v61 = vpack.c.bf16 %v3837_v7, %v3838_v49  ;;  %v2159_v9 = vpack.c.bf16 %v802_v55, %v801_v10  ;;  %v3371_v11 = vadd.f32 %v3077_v45, %v518_v42  ;;  %v3842_v23 = vpack.c.bf16 %v3840_v4, %v3841_v17  ;;  %v836_v26 = vld [vmem:[#allocation2 + $0x548] sm:$0xff]  ;;  %v821_v45 = vld [vmem:[#allocation2 + $0x4d0] sm:$0xff]  ;;  %v854_v38 = vld [vmem:[#allocation2 + $0x5d8] sm:$0xff] }
  0xe6   :  { %v357_v34 = vadd.f32 %v325_v5, %v165_v27  ;;  %v3845_v16 = vpack.c.bf16 %v3843_v14, %v3844_v43  ;;  %v2191_v29 = vpack.c.bf16 %v834_v21, %v833_v0  ;;  %v2161_v15 = vpack.c.bf16 %v820_v18, %v819_v12  ;;  %v853_v8 = vld [vmem:[#allocation2 + $0x5d0] sm:$0xff]  ;;  %v806_v31 = vld [vmem:[#allocation2 + $0x458] sm:$0xff]  ;;  %v823_v35 = vld [vmem:[#allocation2 + $0x4e0] sm:$0xff] }
  0xe7   :  { %2156 = vmatpush3.bf16.msra.mxu0 %v3839_v61  ;;  %2188 = vmatpush3.bf16.msra.mxu1 %v3842_v23  ;;  %v515_v3 = vadd.f32 %v483_v36, %v355_v33  ;;  %v2193_v24 = vpack.c.bf16 %v852_v2, %v851_v63  ;;  %v2163_v52 = vpack.c.bf16 %v804_v58, %v803_v46  ;;  %v805_v0 = vld [vmem:[#allocation2 + $0x450] sm:$0xff]  ;;  %v838_v25 = vld [vmem:[#allocation2 + $0x558] sm:$0xff]  ;;  %v824_v60 = vld [vmem:[#allocation2 + $0x4e8] sm:$0xff] }
  0xe8   :  { %2158 = vmatprep.subr.bf16.mxu0 %v3845_v16  ;;  %2190 = vmatprep.subr.bf16.mxu1 %v2189_v37  ;;  %v517_v13 = vadd.f32 %v485_v54, %v357_v34  ;;  %v2195_v10 = vpack.c.bf16 %v836_v26, %v835_v1  ;;  %v2165_v55 = vpack.c.bf16 %v822_v44, %v821_v45  ;;  %v837_v19 = vld [vmem:[#allocation2 + $0x550] sm:$0xff]  ;;  %v3847_v21 = vld [vmem:[#allocation69_spill] sm:$0xff]  ;;  %v856_v18 = vld [vmem:[#allocation2 + $0x5e8] sm:$0xff] }
  0xe9   :  { %v3380_v30 = vadd.f32 %v3098_v50, %v515_v3  ;;  %v2197_v36 = vpack.c.bf16 %v854_v38, %v853_v8  ;;  %v3846_v50 = vld [vmem:[#allocation49_spill] sm:$0xff]  ;;  %v320_v12 = vmul.f32 %v3847_v21, %v2957_v56  ;;  %v162_v42 = vmul.f32 %v3774_v20, %v2939_v62  ;;  %v3848_v27 = vld [vmem:[#allocation75_spill] sm:$0xff]  ;;  %v808_v7 = vld [vmem:[#allocation2 + $0x468] sm:$0xff] }
  0xea   :  { %v3383_v51 = vadd.f32 %v3133_v41, %v517_v13  ;;  %v160_v37 = vmul.f32 %v3846_v50, %v2939_v62  ;;  %v855_v41 = vld [vmem:[#allocation2 + $0x5e0] sm:$0xff]  ;;  %v322_v5 = vmul.f32 %v3848_v27, %v2957_v56  ;;  %v2167_v63 = vpack.c.bf16 %v806_v31, %v805_v0  ;;  %v825_v34 = vld [vmem:[#allocation2 + $0x4f0] sm:$0xff]  ;;  %v826_v4 = vld [vmem:[#allocation2 + $0x4f8] sm:$0xff] }
  0xeb   :  { %2160 = vmatpush3.bf16.msra.mxu0 %v2159_v9  ;;  %2192 = vmatpush3.bf16.msra.mxu1 %v2191_v29  ;;  %v2199_v2 = vpack.c.bf16 %v838_v25, %v837_v19  ;;  %v2169_v33 = vpack.c.bf16 %v824_v60, %v823_v35  ;;  %v807_v54 = vld [vmem:[#allocation2 + $0x460] sm:$0xff]  ;;  %v2201_v61 = vpack.c.bf16 %v856_v18, %v855_v41  ;;  %v840_v9 = vld [vmem:[#allocation2 + $0x568] sm:$0xff]  ;;  %v857_v20 = vld [vmem:[#allocation2 + $0x5f0] sm:$0xff] }
  0xec   :  { %2162 = vmatprep.subr.bf16.mxu0 %v2161_v15  ;;  %2194 = vmatprep.subr.bf16.mxu1 %v2193_v24  ;;  %v839_v49 = vld [vmem:[#allocation2 + $0x560] sm:$0xff]  ;;  %v352_v17 = vadd.f32 %v320_v12, %v160_v37  ;;  %v480_v62 = vmul.f32 %v3773_v53, %v2967_v32  ;;  %v858_v56 = vld [vmem:[#allocation2 + $0x5f8] sm:$0xff]  ;;  %v354_v23 = vadd.f32 %v322_v5, %v162_v42  ;;  %v809_v46 = vld [vmem:[#allocation2 + $0x470] sm:$0xff] }
  0xed   :  { %v3849_v14 = vld [vmem:[#allocation76_spill] sm:$0xff]  ;;  %v2171_v16 = vpack.c.bf16 %v808_v7, %v807_v54  ;;  %v2203_v29 = vpack.c.bf16 %v840_v9, %v839_v49  ;;  %v2173_v15 = vpack.c.bf16 %v826_v4, %v825_v34  ;;  %v841_v1 = vld [vmem:[#allocation2 + $0x570] sm:$0xff]  ;;  %v2205_v3 = vpack.c.bf16 %v858_v56, %v857_v20  ;;  %v875_v26 = vld [vmem:[#allocation2 + $0x680] sm:$0xff] }
  0xee   :  { %v482_v43 = vmul.f32 %v3849_v14, %v2967_v32  ;;  %v810_v58 = vld [vmem:[#allocation2 + $0x478] sm:$0xff]  ;;  %v876_v53 = vld [vmem:[#allocation2 + $0x688] sm:$0xff]  ;;  %v512_v45 = vadd.f32 %v480_v62, %v352_v17  ;;  %v907_v44 = vld [vmem:[#allocation2 + $0x780] sm:$0xff]  ;;  %v659_v4 = vmax.f32 %v3274_v6, 0.0  ;;  %v661_v62 = vmax.f32 %v3285_v47, 0.0 }
  0xef   :  { %2164 = vmatpush3.bf16.msra.mxu0 %v2163_v52  ;;  %2196 = vmatpush3.bf16.msra.mxu1 %v2195_v10  ;;  %v842_v24 = vld [vmem:[#allocation2 + $0x578] sm:$0xff]  ;;  %v908_v13 = vld [vmem:[#allocation2 + $0x788] sm:$0xff]  ;;  %v2175_v32 = vpack.c.bf16 %v810_v58, %v809_v46  ;;  %v2209_v52 = vpack.c.bf16 %v876_v53, %v875_v26  ;;  %v859_v0 = vld [vmem:[#allocation2 + $0x600] sm:$0xff]  ;;  %v648_v20 = vmax.f32 %v3303_v48, 0.0 }
  0xf0   :  { %2166 = vmatprep.subr.bf16.mxu0 %v2165_v55  ;;  %2198 = vmatprep.subr.bf16.mxu1 %v2197_v36  ;;  %v514_v8 = vadd.f32 %v482_v43, %v354_v23  ;;  %v2207_v38 = vpack.c.bf16 %v842_v24, %v841_v1  ;;  %v2241_v10 = vpack.c.bf16 %v908_v13, %v907_v44  ;;  %v860_v31 = vld [vmem:[#allocation2 + $0x608] sm:$0xff]  ;;  %v891_v19 = vld [vmem:[#allocation2 + $0x700] sm:$0xff]  ;;  %v877_v35 = vld [vmem:[#allocation2 + $0x690] sm:$0xff] }
  0xf1   :  { %v628_v55 = vadd.f32 %v3818_v40, %v512_v45  ;;  %v892_v25 = vld [vmem:[#allocation2 + $0x708] sm:$0xff]  ;;  %v878_v60 = vld [vmem:[#allocation2 + $0x698] sm:$0xff]  ;;  %v909_v50 = vld [vmem:[#allocation2 + $0x790] sm:$0xff]  ;;  %v2211_v41 = vpack.c.bf16 %v860_v31, %v859_v0 }
  0xf2   :  { %v630_v36 = vadd.f32 %v3821_v57, %v514_v8  ;;  %v910_v37 = vld [vmem:[#allocation2 + $0x798] sm:$0xff]  ;;  %v3851_v18 = vld [vmem:[#allocation15_spill] sm:$0xff]  ;;  %v2243_v27 = vpack.c.bf16 %v892_v25, %v891_v19  ;;  %v2213_v5 = vpack.c.bf16 %v878_v60, %v877_v35  ;;  %v879_v49 = vld [vmem:[#allocation2 + $0x6a0] sm:$0xff] }
  0xf3   :  { %2168 = vmatpush3.bf16.msra.mxu0 %v2167_v63  ;;  %2200 = vmatpush3.bf16.msra.mxu1 %v2199_v2  ;;  %v3850_v21 = vld [vmem:[#allocation16_spill] sm:$0xff]  ;;  %v645_v42 = vmax.f32 %v3851_v18, 0.0  ;;  %v660_v40 = vmax.f32 %v628_v55, 0.0  ;;  %v861_v63 = vld [vmem:[#allocation2 + $0x610] sm:$0xff]  ;;  %v2245_v54 = vpack.c.bf16 %v910_v37, %v909_v50  ;;  %v911_v9 = vld [vmem:[#allocation2 + $0x7a0] sm:$0xff] }
  0xf4   :  { %2170 = vmatprep.subr.bf16.mxu0 %v2169_v33  ;;  %2202 = vmatprep.subr.bf16.mxu1 %v2201_v61  ;;  %v643_v12 = vmax.f32 %v3850_v21, 0.0  ;;  %v862_v2 = vld [vmem:[#allocation2 + $0x618] sm:$0xff]  ;;  %v893_v57 = vld [vmem:[#allocation2 + $0x710] sm:$0xff]  ;;  %v662_v33 = vmax.f32 %v630_v36, 0.0  ;;  %v880_v61 = vld [vmem:[#allocation2 + $0x6a8] sm:$0xff] }
  0xf5   :  { %v894_v7 = vld [vmem:[#allocation2 + $0x718] sm:$0xff]  ;;  %v912_v34 = vld [vmem:[#allocation2 + $0x7a8] sm:$0xff]  ;;  %v2215_v17 = vpack.c.bf16 %v862_v2, %v861_v63  ;;  %v2217_v23 = vpack.c.bf16 %v880_v61, %v879_v49  ;;  %v863_v14 = vld [vmem:[#allocation2 + $0x620] sm:$0xff] }
  0xf6   :  { %v2247_v56 = vpack.c.bf16 %v894_v7, %v893_v57  ;;  %v864_v43 = vld [vmem:[#allocation2 + $0x628] sm:$0xff]  ;;  %v881_v58 = vld [vmem:[#allocation2 + $0x6b0] sm:$0xff]  ;;  %v882_v6 = vld [vmem:[#allocation2 + $0x6b8] sm:$0xff] }
  0xf7   :  { %2172 = vmatpush3.bf16.msra.mxu0 %v2171_v16  ;;  %2204 = vmatpush3.bf16.msra.mxu1 %v2203_v29  ;;  %v895_v16 = vld [vmem:[#allocation2 + $0x720] sm:$0xff]  ;;  %v650_v29 = vmax.f32 %v3311_v22, 0.0  ;;  %v896_v46 = vld [vmem:[#allocation2 + $0x728] sm:$0xff]  ;;  %v913_v1 = vld [vmem:[#allocation2 + $0x7b0] sm:$0xff]  ;;  %v2219_v48 = vpack.c.bf16 %v864_v43, %v863_v14  ;;  %v2221_v24 = vpack.c.bf16 %v882_v6, %v881_v58 }
  0xf8   :  { %2174 = vmatprep.subr.bf16.mxu0 %v2173_v15  ;;  %2206 = vmatprep.subr.bf16.mxu1 %v2205_v3  ;;  %v2249_v15 = vpack.c.bf16 %v912_v34, %v911_v9  ;;  %v914_v47 = vld [vmem:[#allocation2 + $0x7b8] sm:$0xff]  ;;  %v2251_v3 = vpack.c.bf16 %v896_v46, %v895_v16  ;;  %v865_v26 = vld [vmem:[#allocation2 + $0x630] sm:$0xff]  ;;  %v883_v13 = vld [vmem:[#allocation2 + $0x6c0] sm:$0xff] }
  0xf9   :  { %v866_v53 = vld [vmem:[#allocation2 + $0x638] sm:$0xff]  ;;  %v897_v45 = vld [vmem:[#allocation2 + $0x730] sm:$0xff]  ;;  %v2253_v22 = vpack.c.bf16 %v914_v47, %v913_v1  ;;  %v884_v8 = vld [vmem:[#allocation2 + $0x6c8] sm:$0xff] }
  0xfa   :  { %v898_v44 = vld [vmem:[#allocation2 + $0x738] sm:$0xff]  ;;  %v2225_v55 = vpack.c.bf16 %v884_v8, %v883_v13  ;;  %v867_v0 = vld [vmem:[#allocation2 + $0x640] sm:$0xff]  ;;  %v868_v31 = vld [vmem:[#allocation2 + $0x648] sm:$0xff] }
  0xfb   :  { %2176 = vmatpush3.bf16.msra.mxu0 %v2175_v32  ;;  %2208 = vmatpush3.bf16.msra.mxu1 %v2207_v38  ;;  %v915_v32 = vld [vmem:[#allocation2 + $0x7c0] sm:$0xff]  ;;  %v916_v38 = vld [vmem:[#allocation2 + $0x7c8] sm:$0xff]  ;;  %v885_v35 = vld [vmem:[#allocation2 + $0x6d0] sm:$0xff]  ;;  %v2227_v21 = vpack.c.bf16 %v868_v31, %v867_v0 }
  0xfc   :  { %2210 = vmatprep.subr.bf16.mxu0 %v2209_v52  ;;  %2242 = vmatprep.subr.bf16.mxu1 %v2241_v10  ;;  %v2223_v52 = vpack.c.bf16 %v866_v53, %v865_v26  ;;  %v2255_v10 = vpack.c.bf16 %v898_v44, %v897_v45  ;;  %v899_v19 = vld [vmem:[#allocation2 + $0x740] sm:$0xff]  ;;  %v2257_v36 = vpack.c.bf16 %v916_v38, %v915_v32  ;;  %v900_v25 = vld [vmem:[#allocation2 + $0x748] sm:$0xff]  ;;  %v886_v60 = vld [vmem:[#allocation2 + $0x6d8] sm:$0xff]  ;;  %v666_v26 = vmax.f32 %v3371_v11, 0.0 }
  0xfd   :  { %v917_v50 = vld [vmem:[#allocation2 + $0x7d0] sm:$0xff]  ;;  %v918_v37 = vld [vmem:[#allocation2 + $0x7d8] sm:$0xff]  ;;  %v887_v63 = vld [vmem:[#allocation2 + $0x6e0] sm:$0xff]  ;;  %v663_v53 = vmax.f32 %v3380_v30, 0.0  ;;  %v665_v45 = vmax.f32 %v3383_v51, 0.0 }
  0xfe   :  { %1295 = vmatmul.mubr.f32.vlgmr.msra.gmra.mrb[8].mxu0 %v643_v12  ;;  %1370 = vmatmul.mubr.f32.vlgmr.msra.gmra.mrb[8].mxu1 %v645_v42  ;;  %v2259_v12 = vpack.c.bf16 %v900_v25, %v899_v19  ;;  %v869_v18 = vld [vmem:[#allocation2 + $0x650] sm:$0xff]  ;;  %v870_v42 = vld [vmem:[#allocation2 + $0x658] sm:$0xff]  ;;  %v888_v2 = vld [vmem:[#allocation2 + $0x6e8] sm:$0xff] }
  0xff   :  { %1299 = vmatprep.mubr.f32.mxu0 %v660_v40  ;;  %1374 = vmatprep.mubr.f32.mxu1 %v662_v33  ;;  %v901_v40 = vld [vmem:[#allocation2 + $0x750] sm:$0xff]  ;;  %v919_v57 = vld [vmem:[#allocation2 + $0x7e0] sm:$0xff]  ;;  %v920_v33 = vld [vmem:[#allocation2 + $0x7e8] sm:$0xff]  ;;  %v2233_v49 = vpack.c.bf16 %v888_v2, %v887_v63 }
 0x100   :  { %2212 = vmatpush3.bf16.msra.mxu0 %v2211_v41  ;;  %2244 = vmatpush3.bf16.msra.mxu1 %v2243_v27  ;;  %v2229_v41 = vpack.c.bf16 %v886_v60, %v885_v35  ;;  %v2261_v27 = vpack.c.bf16 %v918_v37, %v917_v50  ;;  %v871_v61 = vld [vmem:[#allocation2 + $0x660] sm:$0xff]  ;;  %v872_v9 = vld [vmem:[#allocation2 + $0x668] sm:$0xff]  ;;  %v905_v58 = vld [vmem:[#allocation2 + $0x770] sm:$0xff] }
 0x101   :  { %2214 = vmatprep.subr.bf16.mxu0 %v2213_v5  ;;  %2246 = vmatprep.subr.bf16.mxu1 %v2245_v54  ;;  %v902_v5 = vld [vmem:[#allocation2 + $0x758] sm:$0xff]  ;;  %v2231_v54 = vpack.c.bf16 %v870_v42, %v869_v18  ;;  %v903_v34 = vld [vmem:[#allocation2 + $0x760] sm:$0xff]  ;;  %v2235_v14 = vpack.c.bf16 %v872_v9, %v871_v61  ;;  %v1535_v44 = vld [vmem:[%s3476_s5 + $0x28] sm:$0xff] }
 0x102   :  { %1300 = vmatmul.mubr.f32.gmra.mrb[10].mxu0 %v659_v4  ;;  %1375 = vmatmul.mubr.f32.gmra.mrb[10].mxu1 %v661_v62  ;;  %v2263_v7 = vpack.c.bf16 %v902_v5, %v901_v40  ;;  %v2265_v4 = vpack.c.bf16 %v920_v33, %v919_v57  ;;  %v889_v62 = vld [vmem:[#allocation2 + $0x6f0] sm:$0xff]  ;;  %v906_v6 = vld [vmem:[#allocation2 + $0x778] sm:$0xff]  ;;  %v1543_v25 = vld [vmem:[%s3476_s5 + $0x68] sm:$0xff] }
 0x103   :  { %1444 = vmatprep.mubr.f32.mxu0 %v648_v20  ;;  %1519 = vmatprep.mubr.f32.mxu1 %v650_v29  ;;  %v890_v20 = vld [vmem:[#allocation2 + $0x6f8] sm:$0xff]  ;;  %v873_v29 = vld [vmem:[#allocation2 + $0x670] sm:$0xff]  ;;  %v2271_v47 = vpack.c.bf16 %v906_v6, %v905_v58 }
 0x104   :  { %2216 = vmatpush3.bf16.msra.mxu0 %v2215_v17  ;;  %2248 = vmatpush3.bf16.msra.mxu1 %v2247_v56  ;;  %v904_v17 = vld [vmem:[#allocation2 + $0x768] sm:$0xff]  ;;  %v921_v56 = vld [vmem:[#allocation2 + $0x7f0] sm:$0xff]  ;;  %v2237_v16 = vpack.c.bf16 %v890_v20, %v889_v62  ;;  %v1533_v30 = vld [vmem:[%s3476_s5 + $0x18] sm:$0xff] }
 0x105   :  { %2218 = vmatprep.subr.bf16.mxu0 %v2217_v23  ;;  %2250 = vmatprep.subr.bf16.mxu1 %v2249_v15  ;;  %v922_v23 = vld [vmem:[#allocation2 + $0x7f8] sm:$0xff]  ;;  %v2267_v43 = vpack.c.bf16 %v904_v17, %v903_v34  ;;  %v1536_v8 = vld [vmem:[%s3476_s5 + $0x30] sm:$0xff] }
 0x106   :  { %v874_v15 = vld [vmem:[#allocation2 + $0x678] sm:$0xff]  ;;  %v2269_v46 = vpack.c.bf16 %v922_v23, %v921_v56  ;;  %v1540_v0 = vld [vmem:[%s3476_s5 + $0x50] sm:$0xff] }
 0x107   :  { %v2239_v1 = vpack.c.bf16 %v874_v15, %v873_v29  ;;  %v1537_v32 = vld [vmem:[%s3476_s5 + $0x38] sm:$0xff]  ;;  %v1544_v60 = vld [vmem:[%s3476_s5 + $0x70] sm:$0xff] }
 0x108   :  { %2220 = vmatpush3.bf16.msra.mxu0 %v2219_v48  ;;  %2252 = vmatpush3.bf16.msra.mxu1 %v2251_v3  ;;  %v647_v48 = vmax.f32 %v3333_v28, 0.0  ;;  %v649_v3 = vmax.f32 %v3341_v39, 0.0  ;;  %v1530_v28 = vld [vmem:[%s3476_s5] sm:$0xff]  ;;  %v1531_v39 = vld [vmem:[%s3476_s5 + $0x8] sm:$0xff]  ;;  %v2285_v38 = vpack.c.bf16 %v1537_v32, %v1536_v8  ;;  %v1541_v31 = vld [vmem:[%s3476_s5 + $0x58] sm:$0xff] }
 0x109   :  { %2222 = vmatprep.subr.bf16.mxu0 %v2221_v24  ;;  %2254 = vmatprep.subr.bf16.mxu1 %v2253_v22  ;;  %v664_v24 = vmax.f32 %v3363_v59, 0.0  ;;  %v1532_v59 = vld [vmem:[%s3476_s5 + $0x10] sm:$0xff]  ;;  %v2273_v11 = vpack.c.bf16 %v1531_v39, %v1530_v28  ;;  %v1534_v22 = vld [vmem:[%s3476_s5 + $0x20] sm:$0xff]  ;;  %v2293_v19 = vpack.c.bf16 %v1541_v31, %v1540_v0  ;;  %v1545_v50 = vld [vmem:[%s3476_s5 + $0x78] sm:$0xff] }
 0x10a   :  { %v2277_v51 = vpack.c.bf16 %v1533_v30, %v1532_v59  ;;  %v2281_v13 = vpack.c.bf16 %v1535_v44, %v1534_v22  ;;  %v2301_v37 = vpack.c.bf16 %v1545_v50, %v1544_v60 }
 0x10c   :  { %2224 = vmatpush3.bf16.msra.mxu0 %v2223_v52  ;;  %2256 = vmatpush3.bf16.msra.mxu1 %v2255_v10  ;;  %v1538_v52 = vld [vmem:[%s3476_s5 + $0x40] sm:$0xff]  ;;  %v1539_v10 = vld [vmem:[%s3476_s5 + $0x48] sm:$0xff] }
 0x10d   :  { %2226 = vmatprep.subr.bf16.mxu0 %v2225_v55  ;;  %2258 = vmatprep.subr.bf16.mxu1 %v2257_v36  ;;  %v2289_v55 = vpack.c.bf16 %v1539_v10, %v1538_v52  ;;  %v1542_v36 = vld [vmem:[%s3476_s5 + $0x60] sm:$0xff] }
 0x10e   :  { %v2297_v35 = vpack.c.bf16 %v1543_v25, %v1542_v36 }
 0x110   :  { %2228 = vmatpush3.bf16.msra.mxu0 %v2227_v21  ;;  %2260 = vmatpush3.bf16.msra.mxu1 %v2259_v12 }
 0x111   :  { %2230 = vmatprep.subr.bf16.mxu0 %v2229_v41  ;;  %2262 = vmatprep.subr.bf16.mxu1 %v2261_v27  ;;  %v1658_v41 = vld [vmem:[%s3475_s4] ss:$0 sm:$0xff] }
 0x114   :  { %2232 = vmatpush3.bf16.msra.mxu0 %v2231_v54  ;;  %2264 = vmatpush3.bf16.msra.mxu1 %v2263_v7 }
 0x115   :  { %2234 = vmatprep.subr.bf16.mxu0 %v2233_v49  ;;  %2266 = vmatprep.subr.bf16.mxu1 %v2265_v4 }
 0x118   :  { %2236 = vmatpush3.bf16.msra.mxu0 %v2235_v14  ;;  %2268 = vmatpush3.bf16.msra.mxu1 %v2267_v43 }
 0x119   :  { %2238 = vmatprep.subr.bf16.mxu0 %v2237_v16  ;;  %2270 = vmatprep.subr.bf16.mxu1 %v2269_v46 }
 0x11c   :  { %2240 = vmatpush3.bf16.msra.mxu0 %v2239_v1  ;;  %2272 = vmatpush3.bf16.msra.mxu1 %v2271_v47 }
 0x11d   :  { %2274 = vmatprep.subr.bf16.mxu0 %v2273_v11 }
 0x11f   :  { %1445 = vmatmul.mubr.f32.vlgmr.msra.gmra.mrb[12].mxu0 %v647_v48  ;;  %1520 = vmatmul.mubr.f32.vlgmr.msra.gmra.mrb[12].mxu1 %v649_v3 }
 0x120   :  { %1449 = vmatprep.mubr.f32.mxu0 %v664_v24  ;;  %1524 = vmatprep.mubr.f32.mxu1 %v666_v26 }
 0x121   :  { %2276 = vmatpush3.bf16.msra.mxu0 %v2273_v11 }
 0x122   :  { %2278 = vmatprep.subr.bf16.mxu0 %v2277_v51 }
 0x123   :  { %1450 = vmatmul.mubr.f32.gmra.mrb[14].mxu0 %v663_v53  ;;  %1525 = vmatmul.mubr.f32.gmra.mrb[14].mxu1 %v665_v45 }
 0x125   :  { %2280 = vmatpush3.bf16.msra.mxu0 %v2277_v51 }
 0x126   :  { %2282 = vmatprep.subr.bf16.mxu0 %v2281_v13 }
 0x129   :  { %2284 = vmatpush3.bf16.msra.mxu0 %v2281_v13 }
 0x12a   :  { %2286 = vmatprep.subr.bf16.mxu0 %v2285_v38 }
 0x12d   :  { %2288 = vmatpush3.bf16.msra.mxu0 %v2285_v38 }
 0x12e   :  { %2290 = vmatprep.subr.bf16.mxu0 %v2289_v55 }
 0x131   :  { %2292 = vmatpush3.bf16.msra.mxu0 %v2289_v55 }
 0x132   :  { %2294 = vmatprep.subr.bf16.mxu0 %v2293_v19 }
 0x135   :  { %2296 = vmatpush3.bf16.msra.mxu0 %v2293_v19 }
 0x136   :  { %2298 = vmatprep.subr.bf16.mxu0 %v2297_v35 }
 0x139   :  { %2300 = vmatpush3.bf16.msra.mxu0 %v2297_v35 }
 0x13a   :  { %2302 = vmatprep.subr.bf16.mxu0 %v2301_v37 }
 0x13d   :  { %2304 = vmatpush3.bf16.msra.mxu0 %v2301_v37 }
 0x185   :  { %v1692_v21 = vpop.f32.mrb[0].mxu0  ;;  %v1730_v12 = vpop.f32.mrb[0].mxu1 }
 0x186   :  { %v1693_v18 = vpop.f32.mrb[1].mxu0  ;;  %v1731_v42 = vpop.f32.mrb[1].mxu1 }
 0x187   :  { %v1694_v40 = vadd.f32 %v1693_v18, %v1692_v21  ;;  %v1732_v27 = vadd.f32 %v1731_v42, %v1730_v12  ;;  %v1659_v12 = vld [vmem:[%s3477_s6] ss:$0 sm:$0xff] }
 0x189   :  { %v997_v5 = vadd.f32 %v1694_v40, %v1658_v41 }
 0x18b   :  { %v1072_v63 = vadd.f32 %v1732_v27, %v997_v5 }
 0x18d   :  { %v1695_v2 = vpop.f32.mrb[2].mxu0 }
 0x18e   :  { %v1696_v57 = vpop.f32.mrb[3].mxu0 }
 0x18f   :  { %v1697_v33 = vadd.f32 %v1696_v57, %v1695_v2  ;;  %v1733_v54 = vpop.f32.mrb[2].mxu1 }
 0x190   :  { %v1734_v49 = vpop.f32.mrb[3].mxu1 }
 0x191   :  { %v1002_v7 = vadd.f32 %v1697_v33, %v1658_v41  ;;  %v1735_v61 = vadd.f32 %v1734_v49, %v1733_v54 }
 0x193   :  { %v1077_v9 = vadd.f32 %v1735_v61, %v1002_v7 }
 0x1ad   :  { %v1768_v34 = vpop.f32.mrb[4].mxu0 }
 0x1ae   :  { %v1806_v4 = vpop.f32.mrb[4].mxu1  ;;  %v1769_v17 = vpop.f32.mrb[5].mxu0 }
 0x1af   :  { %v1770_v62 = vadd.f32 %v1769_v17, %v1768_v34  ;;  %v1807_v20 = vpop.f32.mrb[5].mxu1 }
 0x1b0   :  { %v1808_v56 = vadd.f32 %v1807_v20, %v1806_v4 }
 0x1b1   :  { %v1147_v23 = vadd.f32 %v1770_v62, %v1072_v63  ;;  %v1771_v14 = vpop.f32.mrb[6].mxu0 }
 0x1b2   :  { %v1809_v43 = vpop.f32.mrb[6].mxu1  ;;  %v1772_v16 = vpop.f32.mrb[7].mxu0 }
 0x1b3   :  { %v1222_v29 = vadd.f32 %v1808_v56, %v1147_v23  ;;  %v1773_v15 = vadd.f32 %v1772_v16, %v1771_v14  ;;  %v1810_v46 = vpop.f32.mrb[7].mxu1 }
 0x1b4   :  { %v1811_v58 = vadd.f32 %v1810_v46, %v1809_v43 }
 0x1b5   :  { %v1152_v6 = vadd.f32 %v1773_v15, %v1077_v9 }
 0x1b7   :  { %v1227_v1 = vadd.f32 %v1811_v58, %v1152_v6 }
 0x1d1   :  { %v1844_v47 = vpop.f32.mrb[8].mxu0  ;;  %v1882_v48 = vpop.f32.mrb[8].mxu1 }
 0x1d2   :  { %v1845_v3 = vpop.f32.mrb[9].mxu0  ;;  %v1883_v26 = vpop.f32.mrb[9].mxu1 }
 0x1d3   :  { %v1846_v24 = vadd.f32 %v1845_v3, %v1844_v47  ;;  %v1884_v53 = vadd.f32 %v1883_v26, %v1882_v48 }
 0x1d5   :  { %v1297_v45 = vadd.f32 %v1846_v24, %v1222_v29  ;;  %v1847_v28 = vpop.f32.mrb[10].mxu0  ;;  %v1885_v39 = vpop.f32.mrb[10].mxu1 }
 0x1d6   :  { %v1848_v59 = vpop.f32.mrb[11].mxu0  ;;  %v1886_v51 = vpop.f32.mrb[11].mxu1 }
 0x1d7   :  { %v1372_v11 = vadd.f32 %v1884_v53, %v1297_v45  ;;  %v1849_v30 = vadd.f32 %v1848_v59, %v1847_v28  ;;  %v1887_v22 = vadd.f32 %v1886_v51, %v1885_v39 }
 0x1d9   :  { %v1302_v44 = vadd.f32 %v1849_v30, %v1227_v1 }
 0x1db   :  { %v1377_v13 = vadd.f32 %v1887_v22, %v1302_v44 }
 0x1f2   :  { %v1920_v8 = vpop.f32.mrb[12].mxu0  ;;  %v1958_v32 = vpop.f32.mrb[12].mxu1 }
 0x1f3   :  { %v1921_v38 = vpop.f32.mrb[13].mxu0  ;;  %v1959_v10 = vpop.f32.mrb[13].mxu1 }
 0x1f4   :  { %v1922_v52 = vadd.f32 %v1921_v38, %v1920_v8  ;;  %v1960_v55 = vadd.f32 %v1959_v10, %v1958_v32 }
 0x1f6   :  { %v1447_v0 = vadd.f32 %v1922_v52, %v1372_v11  ;;  %v1923_v31 = vpop.f32.mrb[14].mxu0  ;;  %v1961_v19 = vpop.f32.mrb[14].mxu1 }
 0x1f7   :  { %v1924_v36 = vpop.f32.mrb[15].mxu0  ;;  %v1962_v60 = vpop.f32.mrb[15].mxu1 }
 0x1f8   :  { %v1522_v25 = vadd.f32 %v1960_v55, %v1447_v0  ;;  %v1925_v35 = vadd.f32 %v1924_v36, %v1923_v31  ;;  %v1963_v50 = vadd.f32 %v1962_v60, %v1961_v19 }
 0x1fa   :  { %v1452_v37 = vadd.f32 %v1925_v35, %v1377_v13  ;;  %2014 = vmatprep.mubr.f32.mxu0 %v1522_v25 }
 0x1fc   :  { %v1527_v21 = vadd.f32 %v1963_v50, %v1452_v37 }
 0x1fe   :  { %2015 = vmatmul.mubr.f32.vlgmr.msra.gmra.mrb[16].mxu0 %v1527_v21 }
 0x2d1   :  { %v2016_v41 = vpop.f32.mrb[16].mxu0 }
 0x2d2   :  { %v1625_v18 = vadd.f32 %v2016_v41, %v1659_v12  ;;  %v1619_v42 = vpop.f32.mrb[17].mxu0 }
 0x2d3   :  { %v1620_v40 = vadd.f32 %v1659_v12, %v1619_v42 }
 0x2d4   :  { %1630 = vmax.xlane.f32.xlu1 %v1625_v18 }
 0x2d5   :  { %1628 = vmax.xlane.f32.xlu0 %v1620_v40 }
 0x361   :  { %v1631_v27 = vpop.xlane.xlu1 %1630 }
 0x362   :  { %v1633_v5 = vsub.f32 %v1625_v18, %v1631_v27  ;;  %v1629_v63 = vpop.xlane.xlu0 %1628 }
 0x363   :  { %v1632_v2 = vsub.f32 %v1620_v40, %v1629_v63 }
 0x364   :  { %v1636_v57 = vmul.f32 1.442695, %v1633_v5 }
 0x365   :  { %v1634_v33 = vmul.f32 1.442695, %v1632_v2 }
 0x366   :  { %2308 = vpow2.f32 %v1636_v57 }
 0x367   :  { %2310 = vpow2.f32 %v1634_v33 }
 0x370   :  { %v2309_v54 = vpop.eup %2308 }
 0x371   :  { %v2311_v7 = vpop.eup %2310  ;;  %1640 = vadd.xlane.f32.xlu1 %v2309_v54 }
 0x372   :  { %1638 = vadd.xlane.f32.xlu0 %v2311_v7 }
 0x3fe   :  { %v1641_v49 = vpop.xlane.xlu1 %1640 }
 0x3ff   :  { %2312 = vrcp.f32 %v1641_v49  ;;  %v1639_v61 = vpop.xlane.xlu0 %1638 }
 0x400   :  { %2314 = vrcp.f32 %v1639_v61 }
 0x409   :  { %v2313_v9 = vpop.eup %2312 }
 0x40a   :  { %v2315_v34 = vpop.eup %2314  ;;  %v1645_v4 = vmul.f32 %v2313_v9, %v2309_v54 }
 0x40b   :  { %v1644_v17 = vmul.f32 %v2315_v34, %v2311_v7 }
 0x40c   :  { %1647 = vst [vmem:[%s3478_s7 + $0x8] sm:$0xff] %v1645_v4 }
 0x40d   :  { %1646 = vst [vmem:[%s3478_s7] sm:$0xff] %v1644_v17 }
 0x40e   :  { %1652 = vsyncpa [#allocation3], 1 }

</bundles_post_ra>
